<compile_context>
chip_gen: v7x
topology: tpu7x:2x2x1
jax: 0.10.0
libtpu: 0.0.40
codegen_flags: <defaults>
</compile_context>

<pallas_src>
import jax
import jax.numpy as jnp
from jax import lax
from jax.experimental import pallas as pl
from jax.experimental.pallas import tpu as pltpu

# ------------------------- configuration (small, IQ-consistent) -------------------------
B = 2                 # batch
C_IMG, H_IMG, W_IMG = 4, 16, 16
VOCAB = 32            # vocab_size
MAX_LEN = 8           # max_len
HIDDEN = 32           # hidden_size
NUM_CATEGORIES = 4
SOS_ID = 1
EOS_ID = 2            # (unused in fixed-length greedy unroll)
Z_SIZE = 16           # z_size
Z_IMG = 64            # z_img
Z_CAT = 4             # z_category
CAT_EMB = 8           # nn.Embedding(num_categories, 8)
ATT_H = HIDDEN // 4   # category_attention output dim (hidden_size / 4)
DEC_H = 2 * HIDDEN    # decoder RNN hidden size (2 * hidden_size)
GATE_IN = VOCAB + DEC_H          # 96 = [one-hot token | h]
IN_W = C_IMG + Z_SIZE + NUM_CATEGORIES   # 24 packed kernel input width

_VMEM_SPEC = pl.BlockSpec(memory_space=pltpu.MemorySpace.VMEM)

# ---------------- packed "misc" weight slab layout (width 64, 8-row aligned rows) ----------------
MISC_W = max(Z_IMG, DEC_H)       # 64


def _build_misc_layout():
    layout = {}
    off = 0

    def alloc(name, rows):
        nonlocal off
        layout[name] = off
        off = ((off + rows + 7) // 8) * 8   # keep every entry sublane-tile aligned

    alloc("w_img", C_IMG)              # (C_IMG, Z_IMG)        EncoderCNN fc
    alloc("b_img", 1)                  # (1, Z_IMG)
    alloc("w_att_img", Z_IMG)          # (Z_IMG, ATT_H)        category_attention (image part)
    alloc("cat_tbl", NUM_CATEGORIES)   # (NUM_CAT, ATT_H)      precomputed category branch (+b_att)
    alloc("w_mulv", ATT_H)             # (ATT_H, 2*Z_SIZE)     fused [mu | logvar] heads
    alloc("b_mulv", 1)
    alloc("w_t", Z_SIZE)               # (Z_SIZE, Z_IMG)       t_decoder
    alloc("b_t", 1)
    alloc("w_gen", Z_IMG)              # (Z_IMG, DEC_H)        gen_decoder
    alloc("b_gen", 1)
    alloc("w_out", DEC_H)              # (DEC_H, VOCAB)        decoder out projection
    alloc("b_out", 1)
    return layout, off


_MISC, MISC_ROWS = _build_misc_layout()


# ------------------------------- single fused kernel -------------------------------
def _iq_kernel(
    in_ref,       # [B, 24]  f32   packed: pooled_img(4) | eps(16) | category one-hot(4)
    misc_ref,     # [MISC_ROWS, 64] f32 packed small weights (static-offset slices)
    gates_ref,    # [97, 4*DEC_H]  rows 0..95 = [[dec_emb@w_ih],[w_hh]], row 96 = b_ih+b_hh
    logits_ref,   # OUT: [B, MAX_LEN*VOCAB] lane-dense raw-logit slab
):
    f32 = jnp.float32
    nb = in_ref.shape[0]

    pooled = in_ref[:, 0:C_IMG]                                   # [B, C]
    eps = in_ref[:, C_IMG:C_IMG + Z_SIZE]                         # [B, Z_SIZE]
    cat_oh = in_ref[:, C_IMG + Z_SIZE:IN_W]                       # [B, NUM_CATEGORIES]

    def w(name, rows, cols):
        r = _MISC[name]
        return misc_ref[r:r + rows, 0:cols]

    # ----- encode_images -----
    # TODO(synk): EncoderCNN wraps a pretrained ResNet; stand-in is global-average-pool
    # (done wrapper-side, giving the kernel [B, C]) + Linear(C -> z_img).
    img = (jnp.dot(pooled, w("w_img", C_IMG, Z_IMG), preferred_element_type=f32)
           + w("b_img", 1, Z_IMG))                                # [B, Z_IMG]

    # ----- encode_categories + category_attention -----
    # category branch precomputed host-side:
    #   cat_tbl[c] = (relu(emb[c]@Wce1+b)@Wce2+b)@W_att_cat + b_att
    attended = (jnp.dot(img, w("w_att_img", Z_IMG, ATT_H), preferred_element_type=f32)
                + jnp.dot(cat_oh, w("cat_tbl", NUM_CATEGORIES, ATT_H),
                          preferred_element_type=f32))            # [B, ATT_H]

    # ----- encode_into_t: fused [mu | logvar] head + reparameterize_prev -----
    mulv = (jnp.dot(attended, w("w_mulv", ATT_H, 2 * Z_SIZE), preferred_element_type=f32)
            + w("b_mulv", 1, 2 * Z_SIZE))                         # [B, 2*Z_SIZE]
    mus = jnp.clip(mulv[:, :Z_SIZE], -2.0, 2.0)                   # reference clamps both
    logvars = jnp.clip(mulv[:, Z_SIZE:], -20.0, 20.0)
    zs = eps * jnp.exp(0.5 * logvars) + mus                       # [B, Z_SIZE]

    # ----- decode_questions: t_decoder, gen_decoder -> initial LSTM state -----
    t_h = (jnp.dot(zs, w("w_t", Z_SIZE, Z_IMG), preferred_element_type=f32)
           + w("b_t", 1, Z_IMG))                                  # [B, Z_IMG]
    h0 = (jnp.dot(img + t_h, w("w_gen", Z_IMG, DEC_H), preferred_element_type=f32)
          + w("b_gen", 1, DEC_H))                                 # [B, DEC_H]

    # ----- greedy LSTM decode, fully unrolled, ONE fused gate matmul per step -----
    w_gates = gates_ref[0:GATE_IN, :]                             # [96, 4*DEC_H], gates [i|f|o|g]
    b_gates = gates_ref[GATE_IN:GATE_IN + 1, :]                   # [1, 4*DEC_H]
    w_out = w("w_out", DEC_H, VOCAB)                              # [DEC_H, VOCAB]
    b_out = w("b_out", 1, VOCAB)

    vocab_iota = lax.broadcasted_iota(jnp.int32, (nb, VOCAB), 1)  # hoisted (onehot + argmax)
    d = DEC_H
    h = h0
    c = h0                                                        # reference: (hiddens, hiddens)
    tok = jnp.full((nb, 1), SOS_ID, jnp.int32)
    logits_steps = []
    for _ in range(MAX_LEN):
        onehot = (vocab_iota == tok).astype(f32)                  # [B, V]
        x_step = jnp.concatenate([onehot, h], axis=-1)            # [B, 96]
        gates = (jnp.dot(x_step, w_gates, preferred_element_type=f32)
                 + b_gates)                                       # [B, 4*DEC_H]
        # gate columns ordered [i | f | o | g]: one sigmoid over 3*d, one tanh over d
        sig = jax.nn.sigmoid(gates[:, :3 * d])
        g_g = jnp.tanh(gates[:, 3 * d:])
        i_g = sig[:, :d]
        f_g = sig[:, d:2 * d]
        o_g = sig[:, 2 * d:3 * d]
        c = f_g * c + i_g * g_g
        h = o_g * jnp.tanh(c)

        logits = jnp.dot(h, w_out, preferred_element_type=f32) + b_out   # [B, V]
        # greedy argmax on raw logits (== argmax(log_softmax)); log_softmax deferred off-chain
        mx = jnp.max(logits, axis=-1, keepdims=True)
        tok = jnp.min(jnp.where(logits == mx, vocab_iota, VOCAB), axis=-1, keepdims=True)
        logits_steps.append(logits)

    # single lane-dense store: (B, MAX_LEN*VOCAB) = (2, 256)
    logits_ref[...] = jnp.concatenate(logits_steps, axis=-1)


# ------------------------------------ full forward ------------------------------------
@jax.jit
def iq_forward(images, categories, eps, kp):
    # EncoderCNN stand-in pooling done wrapper-side: pass [B, C] instead of a repeated
    # 256 KB [C*H*W, Z_IMG] weight (dominant HBM traffic in the previous version).
    pooled = jnp.mean(images.astype(jnp.float32), axis=(2, 3))                    # (B, C)
    cat_oh = jax.nn.one_hot(categories.astype(jnp.int32), NUM_CATEGORIES,
                            dtype=jnp.float32)                                    # (B, NUM_CAT)
    in_vec = jnp.concatenate([pooled, eps.astype(jnp.float32), cat_oh], axis=-1)  # (B, 24)

    logits_slab = pl.pallas_call(
        _iq_kernel,
        in_specs=[_VMEM_SPEC] * 3,
        out_specs=_VMEM_SPEC,
        out_shape=jax.ShapeDtypeStruct((B, MAX_LEN * VOCAB), jnp.float32),
    )(in_vec, kp["misc_slab"], kp["gates_slab"])

    logits_btv = logits_slab.reshape(B, MAX_LEN, VOCAB)
    # decode_function = F.log_softmax, applied once, vectorized, off the recurrence
    logp_btv = jax.nn.log_softmax(logits_btv, axis=-1)
    log_probs = jnp.transpose(logp_btv, (1, 0, 2))                # (MAX_LEN, B, VOCAB)
    preds = jnp.argmax(logits_btv, axis=-1).astype(jnp.int32)     # parse_outputs_to_tokens
    return log_probs, preds


# -------------------------------- deterministic params --------------------------------
def init_params(key):
    """Torch-like parameter set (weights stored [in, out])."""
    def dense(k, fan_in, fan_out, scale=0.1):
        kw, kb = jax.random.split(k)
        wgt = scale * jax.random.normal(kw, (fan_in, fan_out), jnp.float32)
        b = scale * jax.random.normal(kb, (1, fan_out), jnp.float32)
        return wgt, b

    ks = jax.random.split(key, 16)
    p = {}
    p["w_img"], p["b_img"] = dense(ks[0], C_IMG, Z_IMG)                   # EncoderCNN fc
    p["cat_emb"] = 0.1 * jax.random.normal(ks[1], (NUM_CATEGORIES, CAT_EMB), jnp.float32)
    p["w_ce1"], p["b_ce1"] = dense(ks[2], CAT_EMB, CAT_EMB)               # category_encoder
    p["w_ce2"], p["b_ce2"] = dense(ks[3], CAT_EMB, Z_CAT)
    p["w_att_img"], p["b_att"] = dense(ks[4], Z_IMG, ATT_H)               # category_attention
    p["w_att_cat"], _ = dense(ks[5], Z_CAT, ATT_H)
    p["w_mu"], p["b_mu"] = dense(ks[6], ATT_H, Z_SIZE)                    # mu_category_encoder
    p["w_lv"], p["b_lv"] = dense(ks[7], ATT_H, Z_SIZE)                    # logvar_category_encoder
    p["w_t"], p["b_t"] = dense(ks[8], Z_SIZE, Z_IMG)                      # t_decoder
    p["w_gen"], p["b_gen"] = dense(ks[9], Z_IMG, DEC_H)                   # gen_decoder
    p["dec_emb"] = 0.1 * jax.random.normal(ks[10], (VOCAB, DEC_H), jnp.float32)
    # decoder LSTM: gate columns ordered [i | f | o | g] (zero-cost convention at init time)
    p["w_ih"], p["b_ih"] = dense(ks[11], DEC_H, 4 * DEC_H)
    p["w_hh"], p["b_hh"] = dense(ks[12], DEC_H, 4 * DEC_H)
    p["w_out"], p["b_out"] = dense(ks[13], DEC_H, VOCAB)                  # decoder out proj
    # self.alpha exists in the module but is unused when bayes=False.
    return p


def prepare_params(p):
    """One-time host-side folding into two packed, kernel-ready slabs."""
    # --- category branch precomputed into a [NUM_CATEGORIES, ATT_H] table (b_att folded in) ---
    h1 = jax.nn.relu(p["cat_emb"] @ p["w_ce1"] + p["b_ce1"])              # (NUM_CAT, 8)
    cat_feat = h1 @ p["w_ce2"] + p["b_ce2"]                               # (NUM_CAT, Z_CAT)
    cat_tbl = cat_feat @ p["w_att_cat"] + p["b_att"]                      # (NUM_CAT, ATT_H)

    # --- fused [mu | logvar] projection ---
    w_mulv = jnp.concatenate([p["w_mu"], p["w_lv"]], axis=1)              # (ATT_H, 2*Z_SIZE)
    b_mulv = jnp.concatenate([p["b_mu"], p["b_lv"]], axis=1)

    # --- packed "misc" slab: one DMA instead of ~20 ---
    misc = jnp.zeros((MISC_ROWS, MISC_W), jnp.float32)

    def put(slab, name, arr):
        r = _MISC[name]
        return slab.at[r:r + arr.shape[0], 0:arr.shape[1]].set(arr)

    misc = put(misc, "w_img", p["w_img"])
    misc = put(misc, "b_img", p["b_img"])
    misc = put(misc, "w_att_img", p["w_att_img"])
    misc = put(misc, "cat_tbl", cat_tbl)
    misc = put(misc, "w_mulv", w_mulv)
    misc = put(misc, "b_mulv", b_mulv)
    misc = put(misc, "w_t", p["w_t"])
    misc = put(misc, "b_t", p["b_t"])
    misc = put(misc, "w_gen", p["w_gen"])
    misc = put(misc, "b_gen", p["b_gen"])
    misc = put(misc, "w_out", p["w_out"])
    misc = put(misc, "b_out", p["b_out"])

    # --- LSTM gate slab: [[dec_emb @ w_ih], [w_hh]] stacked + fused bias row ---
    w_emb_ih = p["dec_emb"] @ p["w_ih"]                                   # (VOCAB, 4*DEC_H)
    gates = jnp.concatenate(
        [jnp.concatenate([w_emb_ih, p["w_hh"]], axis=0),                  # (96, 4*DEC_H)
         p["b_ih"] + p["b_hh"]], axis=0)                                  # row 96: fused bias
    return {"misc_slab": misc, "gates_slab": gates}


if __name__ == "__main__":
    key = jax.random.PRNGKey(0)
    k_img, k_eps, k_par = jax.random.split(key, 3)

    images = jax.random.normal(k_img, (B, C_IMG, H_IMG, W_IMG), jnp.float32)
    categories = jnp.array([0, 3], dtype=jnp.int32)
    eps = jax.random.normal(k_eps, (B, Z_SIZE), jnp.float32)    # torch.randn_like(std)
    params = prepare_params(init_params(k_par))

    log_probs, preds = iq_forward(images, categories, eps, params)
    jax.block_until_ready((log_probs, preds))

    assert log_probs.shape == (MAX_LEN, B, VOCAB)
    assert preds.shape == (B, MAX_LEN)
    assert bool(jnp.all(jnp.isfinite(log_probs)))
    print("KERNEL_OK")
</pallas_src>

<mosaic_0001>
module attributes {stable_mosaic.version = 11 : i64} {
  func.func @_iq_kernel(%arg0: memref<2x24xf32, #tpu.memory_space<vmem>>, %arg1: memref<272x64xf32, #tpu.memory_space<vmem>>, %arg2: memref<97x256xf32, #tpu.memory_space<vmem>>, %arg3: memref<2x256xf32, #tpu.memory_space<vmem>>) attributes {dimension_semantics = [], scalar_prefetch = 0 : i64, scratch_operands = 0 : i64, tpu.core_type = #tpu.core_type<tc>} {
    %c0 = arith.constant 0 : index
    %c0_0 = arith.constant 0 : index
    %0 = vector.load %arg0[%c0, %c0_0] : memref<2x24xf32, #tpu.memory_space<vmem>>, vector<2x4xf32>
    %c0_1 = arith.constant 0 : index
    %c4 = arith.constant 4 : index
    %1 = vector.load %arg0[%c0_1, %c4] : memref<2x24xf32, #tpu.memory_space<vmem>>, vector<2x16xf32>
    %c0_2 = arith.constant 0 : index
    %c20 = arith.constant 20 : index
    %2 = vector.load %arg0[%c0_2, %c20] : memref<2x24xf32, #tpu.memory_space<vmem>>, vector<2x4xf32>
    %c0_3 = arith.constant 0 : index
    %c0_4 = arith.constant 0 : index
    %3 = vector.load %arg1[%c0_3, %c0_4] : memref<272x64xf32, #tpu.memory_space<vmem>>, vector<4x64xf32>
    %cst = arith.constant dense<0.000000e+00> : vector<2x64xf32>
    %4 = tpu.matmul %0, %3, %cst {dimension_numbers = #tpu.dot_dimension_numbers<[1], [0], [0], [1], [0, 0, 1, 1], [], []>} : vector<2x4xf32>, vector<4x64xf32>, vector<2x64xf32> -> vector<2x64xf32>
    %c8 = arith.constant 8 : index
    %c0_5 = arith.constant 0 : index
    %5 = vector.load %arg1[%c8, %c0_5] : memref<272x64xf32, #tpu.memory_space<vmem>>, vector<1x64xf32>
    %6 = vector.broadcast %5 : vector<1x64xf32> to vector<2x64xf32>
    %7 = arith.addf %4, %6 : vector<2x64xf32>
    %c16 = arith.constant 16 : index
    %c0_6 = arith.constant 0 : index
    %8 = vector.load %arg1[%c16, %c0_6] : memref<272x64xf32, #tpu.memory_space<vmem>>, vector<64x8xf32>
    %cst_7 = arith.constant dense<0.000000e+00> : vector<2x8xf32>
    %9 = tpu.matmul %7, %8, %cst_7 {dimension_numbers = #tpu.dot_dimension_numbers<[1], [0], [0], [1], [0, 0, 1, 1], [], []>} : vector<2x64xf32>, vector<64x8xf32>, vector<2x8xf32> -> vector<2x8xf32>
    %c80 = arith.constant 80 : index
    %c0_8 = arith.constant 0 : index
    %10 = vector.load %arg1[%c80, %c0_8] : memref<272x64xf32, #tpu.memory_space<vmem>>, vector<4x8xf32>
    %cst_9 = arith.constant dense<0.000000e+00> : vector<2x8xf32>
    %11 = tpu.matmul %2, %10, %cst_9 {dimension_numbers = #tpu.dot_dimension_numbers<[1], [0], [0], [1], [0, 0, 1, 1], [], []>} : vector<2x4xf32>, vector<4x8xf32>, vector<2x8xf32> -> vector<2x8xf32>
    %12 = arith.addf %9, %11 : vector<2x8xf32>
    %c88 = arith.constant 88 : index
    %c0_10 = arith.constant 0 : index
    %13 = vector.load %arg1[%c88, %c0_10] : memref<272x64xf32, #tpu.memory_space<vmem>>, vector<8x32xf32>
    %cst_11 = arith.constant dense<0.000000e+00> : vector<2x32xf32>
    %14 = tpu.matmul %12, %13, %cst_11 {dimension_numbers = #tpu.dot_dimension_numbers<[1], [0], [0], [1], [0, 0, 1, 1], [], []>} : vector<2x8xf32>, vector<8x32xf32>, vector<2x32xf32> -> vector<2x32xf32>
    %c96 = arith.constant 96 : index
    %c0_12 = arith.constant 0 : index
    %15 = vector.load %arg1[%c96, %c0_12] : memref<272x64xf32, #tpu.memory_space<vmem>>, vector<1x32xf32>
    %16 = vector.broadcast %15 : vector<1x32xf32> to vector<2x32xf32>
    %17 = arith.addf %14, %16 : vector<2x32xf32>
    %18 = vector.extract_strided_slice %17 {offsets = [0, 0], sizes = [2, 16], strides = [1, 1]} : vector<2x32xf32> to vector<2x16xf32>
    %cst_13 = arith.constant -2.000000e+00 : f32
    %cst_14 = arith.constant 2.000000e+00 : f32
    %19 = vector.broadcast %cst_13 : f32 to vector<2x16xf32>
    %20 = arith.maximumf %19, %18 : vector<2x16xf32>
    %21 = vector.broadcast %cst_14 : f32 to vector<2x16xf32>
    %22 = arith.minimumf %21, %20 : vector<2x16xf32>
    %23 = vector.extract_strided_slice %17 {offsets = [0, 16], sizes = [2, 16], strides = [1, 1]} : vector<2x32xf32> to vector<2x16xf32>
    %cst_15 = arith.constant -2.000000e+01 : f32
    %cst_16 = arith.constant 2.000000e+01 : f32
    %24 = vector.broadcast %cst_15 : f32 to vector<2x16xf32>
    %25 = arith.maximumf %24, %23 : vector<2x16xf32>
    %26 = vector.broadcast %cst_16 : f32 to vector<2x16xf32>
    %27 = arith.minimumf %26, %25 : vector<2x16xf32>
    %cst_17 = arith.constant 5.000000e-01 : f32
    %28 = vector.broadcast %cst_17 : f32 to vector<2x16xf32>
    %29 = arith.mulf %28, %27 : vector<2x16xf32>
    %30 = math.exp %29 : vector<2x16xf32>
    %31 = arith.mulf %1, %30 : vector<2x16xf32>
    %32 = arith.addf %31, %22 : vector<2x16xf32>
    %c104 = arith.constant 104 : index
    %c0_18 = arith.constant 0 : index
    %33 = vector.load %arg1[%c104, %c0_18] : memref<272x64xf32, #tpu.memory_space<vmem>>, vector<16x64xf32>
    %cst_19 = arith.constant dense<0.000000e+00> : vector<2x64xf32>
    %34 = tpu.matmul %32, %33, %cst_19 {dimension_numbers = #tpu.dot_dimension_numbers<[1], [0], [0], [1], [0, 0, 1, 1], [], []>} : vector<2x16xf32>, vector<16x64xf32>, vector<2x64xf32> -> vector<2x64xf32>
    %c120 = arith.constant 120 : index
    %c0_20 = arith.constant 0 : index
    %35 = vector.load %arg1[%c120, %c0_20] : memref<272x64xf32, #tpu.memory_space<vmem>>, vector<1x64xf32>
    %36 = vector.broadcast %35 : vector<1x64xf32> to vector<2x64xf32>
    %37 = arith.addf %34, %36 : vector<2x64xf32>
    %38 = arith.addf %7, %37 : vector<2x64xf32>
    %c128 = arith.constant 128 : index
    %c0_21 = arith.constant 0 : index
    %39 = vector.load %arg1[%c128, %c0_21] : memref<272x64xf32, #tpu.memory_space<vmem>>, vector<64x64xf32>
    %cst_22 = arith.constant dense<0.000000e+00> : vector<2x64xf32>
    %40 = tpu.matmul %38, %39, %cst_22 {dimension_numbers = #tpu.dot_dimension_numbers<[1], [0], [0], [1], [0, 0, 1, 1], [], []>} : vector<2x64xf32>, vector<64x64xf32>, vector<2x64xf32> -> vector<2x64xf32>
    %c192 = arith.constant 192 : index
    %c0_23 = arith.constant 0 : index
    %41 = vector.load %arg1[%c192, %c0_23] : memref<272x64xf32, #tpu.memory_space<vmem>>, vector<1x64xf32>
    %42 = vector.broadcast %41 : vector<1x64xf32> to vector<2x64xf32>
    %43 = arith.addf %40, %42 : vector<2x64xf32>
    %c0_24 = arith.constant 0 : index
    %c0_25 = arith.constant 0 : index
    %44 = vector.load %arg2[%c0_24, %c0_25] : memref<97x256xf32, #tpu.memory_space<vmem>>, vector<96x256xf32>
    %c96_26 = arith.constant 96 : index
    %c0_27 = arith.constant 0 : index
    %45 = vector.load %arg2[%c96_26, %c0_27] : memref<97x256xf32, #tpu.memory_space<vmem>>, vector<1x256xf32>
    %c200 = arith.constant 200 : index
    %c0_28 = arith.constant 0 : index
    %46 = vector.load %arg1[%c200, %c0_28] : memref<272x64xf32, #tpu.memory_space<vmem>>, vector<64x32xf32>
    %c264 = arith.constant 264 : index
    %c0_29 = arith.constant 0 : index
    %47 = vector.load %arg1[%c264, %c0_29] : memref<272x64xf32, #tpu.memory_space<vmem>>, vector<1x32xf32>
    %48 = tpu.iota {dimensions = array<i32: 1>} : vector<2x32xi32>
    %c1_i32 = arith.constant 1 : i32
    %49 = vector.broadcast %c1_i32 : i32 to vector<2x1xi32>
    %50 = vector.broadcast %49 : vector<2x1xi32> to vector<2x32xi32>
    %51 = arith.cmpi eq, %48, %50 : vector<2x32xi32>
    %52 = arith.extui %51 : vector<2x32xi1> to vector<2x32xi32>
    %53 = arith.sitofp %52 : vector<2x32xi32> to vector<2x32xf32>
    %54 = tpu.concatenate %53, %43 in 1 : vector<2x32xf32>, vector<2x64xf32> -> vector<2x96xf32>
    %cst_30 = arith.constant dense<0.000000e+00> : vector<2x256xf32>
    %55 = tpu.matmul %54, %44, %cst_30 {dimension_numbers = #tpu.dot_dimension_numbers<[1], [0], [0], [1], [0, 0, 1, 1], [], []>} : vector<2x96xf32>, vector<96x256xf32>, vector<2x256xf32> -> vector<2x256xf32>
    %56 = vector.broadcast %45 : vector<1x256xf32> to vector<2x256xf32>
    %57 = arith.addf %55, %56 : vector<2x256xf32>
    %58 = vector.extract_strided_slice %57 {offsets = [0, 0], sizes = [2, 192], strides = [1, 1]} : vector<2x256xf32> to vector<2x192xf32>
    %59 = arith.negf %58 : vector<2x192xf32>
    %60 = math.exp %59 : vector<2x192xf32>
    %cst_31 = arith.constant 1.000000e+00 : f32
    %61 = vector.broadcast %cst_31 : f32 to vector<2x192xf32>
    %62 = arith.addf %61, %60 : vector<2x192xf32>
    %63 = arith.divf %61, %62 : vector<2x192xf32>
    %64 = vector.extract_strided_slice %57 {offsets = [0, 192], sizes = [2, 64], strides = [1, 1]} : vector<2x256xf32> to vector<2x64xf32>
    %65 = math.tanh %64 : vector<2x64xf32>
    %66 = vector.extract_strided_slice %63 {offsets = [0, 0], sizes = [2, 64], strides = [1, 1]} : vector<2x192xf32> to vector<2x64xf32>
    %67 = vector.extract_strided_slice %63 {offsets = [0, 64], sizes = [2, 64], strides = [1, 1]} : vector<2x192xf32> to vector<2x64xf32>
    %68 = vector.extract_strided_slice %63 {offsets = [0, 128], sizes = [2, 64], strides = [1, 1]} : vector<2x192xf32> to vector<2x64xf32>
    %69 = arith.mulf %67, %43 : vector<2x64xf32>
    %70 = arith.mulf %66, %65 : vector<2x64xf32>
    %71 = arith.addf %69, %70 : vector<2x64xf32>
    %72 = math.tanh %71 : vector<2x64xf32>
    %73 = arith.mulf %68, %72 : vector<2x64xf32>
    %cst_32 = arith.constant dense<0.000000e+00> : vector<2x32xf32>
    %74 = tpu.matmul %73, %46, %cst_32 {dimension_numbers = #tpu.dot_dimension_numbers<[1], [0], [0], [1], [0, 0, 1, 1], [], []>} : vector<2x64xf32>, vector<64x32xf32>, vector<2x32xf32> -> vector<2x32xf32>
    %75 = vector.broadcast %47 : vector<1x32xf32> to vector<2x32xf32>
    %76 = arith.addf %74, %75 : vector<2x32xf32>
    %cst_33 = arith.constant dense<0xFF800000> : vector<2xf32>
    %77 = vector.multi_reduction <maximumf>, %76, %cst_33 [1] : vector<2x32xf32> to vector<2xf32>
    %78 = vector.shape_cast %77 : vector<2xf32> to vector<2x1xf32>
    %79 = vector.broadcast %78 : vector<2x1xf32> to vector<2x32xf32>
    %80 = arith.cmpf oeq, %76, %79 : vector<2x32xf32>
    %c32_i32 = arith.constant 32 : i32
    %81 = vector.broadcast %c32_i32 : i32 to vector<2x32xi32>
    %82 = arith.select %80, %48, %81 : vector<2x32xi1>, vector<2x32xi32>
    %cst_34 = arith.constant dense<2147483647> : vector<2xi32>
    %83 = vector.multi_reduction <minsi>, %82, %cst_34 [1] : vector<2x32xi32> to vector<2xi32>
    %84 = vector.shape_cast %83 : vector<2xi32> to vector<2x1xi32>
    %85 = vector.broadcast %84 : vector<2x1xi32> to vector<2x32xi32>
    %86 = arith.cmpi eq, %48, %85 : vector<2x32xi32>
    %87 = arith.extui %86 : vector<2x32xi1> to vector<2x32xi32>
    %88 = arith.sitofp %87 : vector<2x32xi32> to vector<2x32xf32>
    %89 = tpu.concatenate %88, %73 in 1 : vector<2x32xf32>, vector<2x64xf32> -> vector<2x96xf32>
    %cst_35 = arith.constant dense<0.000000e+00> : vector<2x256xf32>
    %90 = tpu.matmul %89, %44, %cst_35 {dimension_numbers = #tpu.dot_dimension_numbers<[1], [0], [0], [1], [0, 0, 1, 1], [], []>} : vector<2x96xf32>, vector<96x256xf32>, vector<2x256xf32> -> vector<2x256xf32>
    %91 = vector.broadcast %45 : vector<1x256xf32> to vector<2x256xf32>
    %92 = arith.addf %90, %91 : vector<2x256xf32>
    %93 = vector.extract_strided_slice %92 {offsets = [0, 0], sizes = [2, 192], strides = [1, 1]} : vector<2x256xf32> to vector<2x192xf32>
    %94 = arith.negf %93 : vector<2x192xf32>
    %95 = math.exp %94 : vector<2x192xf32>
    %cst_36 = arith.constant 1.000000e+00 : f32
    %96 = vector.broadcast %cst_36 : f32 to vector<2x192xf32>
    %97 = arith.addf %96, %95 : vector<2x192xf32>
    %98 = arith.divf %96, %97 : vector<2x192xf32>
    %99 = vector.extract_strided_slice %92 {offsets = [0, 192], sizes = [2, 64], strides = [1, 1]} : vector<2x256xf32> to vector<2x64xf32>
    %100 = math.tanh %99 : vector<2x64xf32>
    %101 = vector.extract_strided_slice %98 {offsets = [0, 0], sizes = [2, 64], strides = [1, 1]} : vector<2x192xf32> to vector<2x64xf32>
    %102 = vector.extract_strided_slice %98 {offsets = [0, 64], sizes = [2, 64], strides = [1, 1]} : vector<2x192xf32> to vector<2x64xf32>
    %103 = vector.extract_strided_slice %98 {offsets = [0, 128], sizes = [2, 64], strides = [1, 1]} : vector<2x192xf32> to vector<2x64xf32>
    %104 = arith.mulf %102, %71 : vector<2x64xf32>
    %105 = arith.mulf %101, %100 : vector<2x64xf32>
    %106 = arith.addf %104, %105 : vector<2x64xf32>
    %107 = math.tanh %106 : vector<2x64xf32>
    %108 = arith.mulf %103, %107 : vector<2x64xf32>
    %cst_37 = arith.constant dense<0.000000e+00> : vector<2x32xf32>
    %109 = tpu.matmul %108, %46, %cst_37 {dimension_numbers = #tpu.dot_dimension_numbers<[1], [0], [0], [1], [0, 0, 1, 1], [], []>} : vector<2x64xf32>, vector<64x32xf32>, vector<2x32xf32> -> vector<2x32xf32>
    %110 = vector.broadcast %47 : vector<1x32xf32> to vector<2x32xf32>
    %111 = arith.addf %109, %110 : vector<2x32xf32>
    %cst_38 = arith.constant dense<0xFF800000> : vector<2xf32>
    %112 = vector.multi_reduction <maximumf>, %111, %cst_38 [1] : vector<2x32xf32> to vector<2xf32>
    %113 = vector.shape_cast %112 : vector<2xf32> to vector<2x1xf32>
    %114 = vector.broadcast %113 : vector<2x1xf32> to vector<2x32xf32>
    %115 = arith.cmpf oeq, %111, %114 : vector<2x32xf32>
    %c32_i32_39 = arith.constant 32 : i32
    %116 = vector.broadcast %c32_i32_39 : i32 to vector<2x32xi32>
    %117 = arith.select %115, %48, %116 : vector<2x32xi1>, vector<2x32xi32>
    %cst_40 = arith.constant dense<2147483647> : vector<2xi32>
    %118 = vector.multi_reduction <minsi>, %117, %cst_40 [1] : vector<2x32xi32> to vector<2xi32>
    %119 = vector.shape_cast %118 : vector<2xi32> to vector<2x1xi32>
    %120 = vector.broadcast %119 : vector<2x1xi32> to vector<2x32xi32>
    %121 = arith.cmpi eq, %48, %120 : vector<2x32xi32>
    %122 = arith.extui %121 : vector<2x32xi1> to vector<2x32xi32>
    %123 = arith.sitofp %122 : vector<2x32xi32> to vector<2x32xf32>
    %124 = tpu.concatenate %123, %108 in 1 : vector<2x32xf32>, vector<2x64xf32> -> vector<2x96xf32>
    %cst_41 = arith.constant dense<0.000000e+00> : vector<2x256xf32>
    %125 = tpu.matmul %124, %44, %cst_41 {dimension_numbers = #tpu.dot_dimension_numbers<[1], [0], [0], [1], [0, 0, 1, 1], [], []>} : vector<2x96xf32>, vector<96x256xf32>, vector<2x256xf32> -> vector<2x256xf32>
    %126 = vector.broadcast %45 : vector<1x256xf32> to vector<2x256xf32>
    %127 = arith.addf %125, %126 : vector<2x256xf32>
    %128 = vector.extract_strided_slice %127 {offsets = [0, 0], sizes = [2, 192], strides = [1, 1]} : vector<2x256xf32> to vector<2x192xf32>
    %129 = arith.negf %128 : vector<2x192xf32>
    %130 = math.exp %129 : vector<2x192xf32>
    %cst_42 = arith.constant 1.000000e+00 : f32
    %131 = vector.broadcast %cst_42 : f32 to vector<2x192xf32>
    %132 = arith.addf %131, %130 : vector<2x192xf32>
    %133 = arith.divf %131, %132 : vector<2x192xf32>
    %134 = vector.extract_strided_slice %127 {offsets = [0, 192], sizes = [2, 64], strides = [1, 1]} : vector<2x256xf32> to vector<2x64xf32>
    %135 = math.tanh %134 : vector<2x64xf32>
    %136 = vector.extract_strided_slice %133 {offsets = [0, 0], sizes = [2, 64], strides = [1, 1]} : vector<2x192xf32> to vector<2x64xf32>
    %137 = vector.extract_strided_slice %133 {offsets = [0, 64], sizes = [2, 64], strides = [1, 1]} : vector<2x192xf32> to vector<2x64xf32>
    %138 = vector.extract_strided_slice %133 {offsets = [0, 128], sizes = [2, 64], strides = [1, 1]} : vector<2x192xf32> to vector<2x64xf32>
    %139 = arith.mulf %137, %106 : vector<2x64xf32>
    %140 = arith.mulf %136, %135 : vector<2x64xf32>
    %141 = arith.addf %139, %140 : vector<2x64xf32>
    %142 = math.tanh %141 : vector<2x64xf32>
    %143 = arith.mulf %138, %142 : vector<2x64xf32>
    %cst_43 = arith.constant dense<0.000000e+00> : vector<2x32xf32>
    %144 = tpu.matmul %143, %46, %cst_43 {dimension_numbers = #tpu.dot_dimension_numbers<[1], [0], [0], [1], [0, 0, 1, 1], [], []>} : vector<2x64xf32>, vector<64x32xf32>, vector<2x32xf32> -> vector<2x32xf32>
    %145 = vector.broadcast %47 : vector<1x32xf32> to vector<2x32xf32>
    %146 = arith.addf %144, %145 : vector<2x32xf32>
    %cst_44 = arith.constant dense<0xFF800000> : vector<2xf32>
    %147 = vector.multi_reduction <maximumf>, %146, %cst_44 [1] : vector<2x32xf32> to vector<2xf32>
    %148 = vector.shape_cast %147 : vector<2xf32> to vector<2x1xf32>
    %149 = vector.broadcast %148 : vector<2x1xf32> to vector<2x32xf32>
    %150 = arith.cmpf oeq, %146, %149 : vector<2x32xf32>
    %c32_i32_45 = arith.constant 32 : i32
    %151 = vector.broadcast %c32_i32_45 : i32 to vector<2x32xi32>
    %152 = arith.select %150, %48, %151 : vector<2x32xi1>, vector<2x32xi32>
    %cst_46 = arith.constant dense<2147483647> : vector<2xi32>
    %153 = vector.multi_reduction <minsi>, %152, %cst_46 [1] : vector<2x32xi32> to vector<2xi32>
    %154 = vector.shape_cast %153 : vector<2xi32> to vector<2x1xi32>
    %155 = vector.broadcast %154 : vector<2x1xi32> to vector<2x32xi32>
    %156 = arith.cmpi eq, %48, %155 : vector<2x32xi32>
    %157 = arith.extui %156 : vector<2x32xi1> to vector<2x32xi32>
    %158 = arith.sitofp %157 : vector<2x32xi32> to vector<2x32xf32>
    %159 = tpu.concatenate %158, %143 in 1 : vector<2x32xf32>, vector<2x64xf32> -> vector<2x96xf32>
    %cst_47 = arith.constant dense<0.000000e+00> : vector<2x256xf32>
    %160 = tpu.matmul %159, %44, %cst_47 {dimension_numbers = #tpu.dot_dimension_numbers<[1], [0], [0], [1], [0, 0, 1, 1], [], []>} : vector<2x96xf32>, vector<96x256xf32>, vector<2x256xf32> -> vector<2x256xf32>
    %161 = vector.broadcast %45 : vector<1x256xf32> to vector<2x256xf32>
    %162 = arith.addf %160, %161 : vector<2x256xf32>
    %163 = vector.extract_strided_slice %162 {offsets = [0, 0], sizes = [2, 192], strides = [1, 1]} : vector<2x256xf32> to vector<2x192xf32>
    %164 = arith.negf %163 : vector<2x192xf32>
    %165 = math.exp %164 : vector<2x192xf32>
    %cst_48 = arith.constant 1.000000e+00 : f32
    %166 = vector.broadcast %cst_48 : f32 to vector<2x192xf32>
    %167 = arith.addf %166, %165 : vector<2x192xf32>
    %168 = arith.divf %166, %167 : vector<2x192xf32>
    %169 = vector.extract_strided_slice %162 {offsets = [0, 192], sizes = [2, 64], strides = [1, 1]} : vector<2x256xf32> to vector<2x64xf32>
    %170 = math.tanh %169 : vector<2x64xf32>
    %171 = vector.extract_strided_slice %168 {offsets = [0, 0], sizes = [2, 64], strides = [1, 1]} : vector<2x192xf32> to vector<2x64xf32>
    %172 = vector.extract_strided_slice %168 {offsets = [0, 64], sizes = [2, 64], strides = [1, 1]} : vector<2x192xf32> to vector<2x64xf32>
    %173 = vector.extract_strided_slice %168 {offsets = [0, 128], sizes = [2, 64], strides = [1, 1]} : vector<2x192xf32> to vector<2x64xf32>
    %174 = arith.mulf %172, %141 : vector<2x64xf32>
    %175 = arith.mulf %171, %170 : vector<2x64xf32>
    %176 = arith.addf %174, %175 : vector<2x64xf32>
    %177 = math.tanh %176 : vector<2x64xf32>
    %178 = arith.mulf %173, %177 : vector<2x64xf32>
    %cst_49 = arith.constant dense<0.000000e+00> : vector<2x32xf32>
    %179 = tpu.matmul %178, %46, %cst_49 {dimension_numbers = #tpu.dot_dimension_numbers<[1], [0], [0], [1], [0, 0, 1, 1], [], []>} : vector<2x64xf32>, vector<64x32xf32>, vector<2x32xf32> -> vector<2x32xf32>
    %180 = vector.broadcast %47 : vector<1x32xf32> to vector<2x32xf32>
    %181 = arith.addf %179, %180 : vector<2x32xf32>
    %cst_50 = arith.constant dense<0xFF800000> : vector<2xf32>
    %182 = vector.multi_reduction <maximumf>, %181, %cst_50 [1] : vector<2x32xf32> to vector<2xf32>
    %183 = vector.shape_cast %182 : vector<2xf32> to vector<2x1xf32>
    %184 = vector.broadcast %183 : vector<2x1xf32> to vector<2x32xf32>
    %185 = arith.cmpf oeq, %181, %184 : vector<2x32xf32>
    %c32_i32_51 = arith.constant 32 : i32
    %186 = vector.broadcast %c32_i32_51 : i32 to vector<2x32xi32>
    %187 = arith.select %185, %48, %186 : vector<2x32xi1>, vector<2x32xi32>
    %cst_52 = arith.constant dense<2147483647> : vector<2xi32>
    %188 = vector.multi_reduction <minsi>, %187, %cst_52 [1] : vector<2x32xi32> to vector<2xi32>
    %189 = vector.shape_cast %188 : vector<2xi32> to vector<2x1xi32>
    %190 = vector.broadcast %189 : vector<2x1xi32> to vector<2x32xi32>
    %191 = arith.cmpi eq, %48, %190 : vector<2x32xi32>
    %192 = arith.extui %191 : vector<2x32xi1> to vector<2x32xi32>
    %193 = arith.sitofp %192 : vector<2x32xi32> to vector<2x32xf32>
    %194 = tpu.concatenate %193, %178 in 1 : vector<2x32xf32>, vector<2x64xf32> -> vector<2x96xf32>
    %cst_53 = arith.constant dense<0.000000e+00> : vector<2x256xf32>
    %195 = tpu.matmul %194, %44, %cst_53 {dimension_numbers = #tpu.dot_dimension_numbers<[1], [0], [0], [1], [0, 0, 1, 1], [], []>} : vector<2x96xf32>, vector<96x256xf32>, vector<2x256xf32> -> vector<2x256xf32>
    %196 = vector.broadcast %45 : vector<1x256xf32> to vector<2x256xf32>
    %197 = arith.addf %195, %196 : vector<2x256xf32>
    %198 = vector.extract_strided_slice %197 {offsets = [0, 0], sizes = [2, 192], strides = [1, 1]} : vector<2x256xf32> to vector<2x192xf32>
    %199 = arith.negf %198 : vector<2x192xf32>
    %200 = math.exp %199 : vector<2x192xf32>
    %cst_54 = arith.constant 1.000000e+00 : f32
    %201 = vector.broadcast %cst_54 : f32 to vector<2x192xf32>
    %202 = arith.addf %201, %200 : vector<2x192xf32>
    %203 = arith.divf %201, %202 : vector<2x192xf32>
    %204 = vector.extract_strided_slice %197 {offsets = [0, 192], sizes = [2, 64], strides = [1, 1]} : vector<2x256xf32> to vector<2x64xf32>
    %205 = math.tanh %204 : vector<2x64xf32>
    %206 = vector.extract_strided_slice %203 {offsets = [0, 0], sizes = [2, 64], strides = [1, 1]} : vector<2x192xf32> to vector<2x64xf32>
    %207 = vector.extract_strided_slice %203 {offsets = [0, 64], sizes = [2, 64], strides = [1, 1]} : vector<2x192xf32> to vector<2x64xf32>
    %208 = vector.extract_strided_slice %203 {offsets = [0, 128], sizes = [2, 64], strides = [1, 1]} : vector<2x192xf32> to vector<2x64xf32>
    %209 = arith.mulf %207, %176 : vector<2x64xf32>
    %210 = arith.mulf %206, %205 : vector<2x64xf32>
    %211 = arith.addf %209, %210 : vector<2x64xf32>
    %212 = math.tanh %211 : vector<2x64xf32>
    %213 = arith.mulf %208, %212 : vector<2x64xf32>
    %cst_55 = arith.constant dense<0.000000e+00> : vector<2x32xf32>
    %214 = tpu.matmul %213, %46, %cst_55 {dimension_numbers = #tpu.dot_dimension_numbers<[1], [0], [0], [1], [0, 0, 1, 1], [], []>} : vector<2x64xf32>, vector<64x32xf32>, vector<2x32xf32> -> vector<2x32xf32>
    %215 = vector.broadcast %47 : vector<1x32xf32> to vector<2x32xf32>
    %216 = arith.addf %214, %215 : vector<2x32xf32>
    %cst_56 = arith.constant dense<0xFF800000> : vector<2xf32>
    %217 = vector.multi_reduction <maximumf>, %216, %cst_56 [1] : vector<2x32xf32> to vector<2xf32>
    %218 = vector.shape_cast %217 : vector<2xf32> to vector<2x1xf32>
    %219 = vector.broadcast %218 : vector<2x1xf32> to vector<2x32xf32>
    %220 = arith.cmpf oeq, %216, %219 : vector<2x32xf32>
    %c32_i32_57 = arith.constant 32 : i32
    %221 = vector.broadcast %c32_i32_57 : i32 to vector<2x32xi32>
    %222 = arith.select %220, %48, %221 : vector<2x32xi1>, vector<2x32xi32>
    %cst_58 = arith.constant dense<2147483647> : vector<2xi32>
    %223 = vector.multi_reduction <minsi>, %222, %cst_58 [1] : vector<2x32xi32> to vector<2xi32>
    %224 = vector.shape_cast %223 : vector<2xi32> to vector<2x1xi32>
    %225 = vector.broadcast %224 : vector<2x1xi32> to vector<2x32xi32>
    %226 = arith.cmpi eq, %48, %225 : vector<2x32xi32>
    %227 = arith.extui %226 : vector<2x32xi1> to vector<2x32xi32>
    %228 = arith.sitofp %227 : vector<2x32xi32> to vector<2x32xf32>
    %229 = tpu.concatenate %228, %213 in 1 : vector<2x32xf32>, vector<2x64xf32> -> vector<2x96xf32>
    %cst_59 = arith.constant dense<0.000000e+00> : vector<2x256xf32>
    %230 = tpu.matmul %229, %44, %cst_59 {dimension_numbers = #tpu.dot_dimension_numbers<[1], [0], [0], [1], [0, 0, 1, 1], [], []>} : vector<2x96xf32>, vector<96x256xf32>, vector<2x256xf32> -> vector<2x256xf32>
    %231 = vector.broadcast %45 : vector<1x256xf32> to vector<2x256xf32>
    %232 = arith.addf %230, %231 : vector<2x256xf32>
    %233 = vector.extract_strided_slice %232 {offsets = [0, 0], sizes = [2, 192], strides = [1, 1]} : vector<2x256xf32> to vector<2x192xf32>
    %234 = arith.negf %233 : vector<2x192xf32>
    %235 = math.exp %234 : vector<2x192xf32>
    %cst_60 = arith.constant 1.000000e+00 : f32
    %236 = vector.broadcast %cst_60 : f32 to vector<2x192xf32>
    %237 = arith.addf %236, %235 : vector<2x192xf32>
    %238 = arith.divf %236, %237 : vector<2x192xf32>
    %239 = vector.extract_strided_slice %232 {offsets = [0, 192], sizes = [2, 64], strides = [1, 1]} : vector<2x256xf32> to vector<2x64xf32>
    %240 = math.tanh %239 : vector<2x64xf32>
    %241 = vector.extract_strided_slice %238 {offsets = [0, 0], sizes = [2, 64], strides = [1, 1]} : vector<2x192xf32> to vector<2x64xf32>
    %242 = vector.extract_strided_slice %238 {offsets = [0, 64], sizes = [2, 64], strides = [1, 1]} : vector<2x192xf32> to vector<2x64xf32>
    %243 = vector.extract_strided_slice %238 {offsets = [0, 128], sizes = [2, 64], strides = [1, 1]} : vector<2x192xf32> to vector<2x64xf32>
    %244 = arith.mulf %242, %211 : vector<2x64xf32>
    %245 = arith.mulf %241, %240 : vector<2x64xf32>
    %246 = arith.addf %244, %245 : vector<2x64xf32>
    %247 = math.tanh %246 : vector<2x64xf32>
    %248 = arith.mulf %243, %247 : vector<2x64xf32>
    %cst_61 = arith.constant dense<0.000000e+00> : vector<2x32xf32>
    %249 = tpu.matmul %248, %46, %cst_61 {dimension_numbers = #tpu.dot_dimension_numbers<[1], [0], [0], [1], [0, 0, 1, 1], [], []>} : vector<2x64xf32>, vector<64x32xf32>, vector<2x32xf32> -> vector<2x32xf32>
    %250 = vector.broadcast %47 : vector<1x32xf32> to vector<2x32xf32>
    %251 = arith.addf %249, %250 : vector<2x32xf32>
    %cst_62 = arith.constant dense<0xFF800000> : vector<2xf32>
    %252 = vector.multi_reduction <maximumf>, %251, %cst_62 [1] : vector<2x32xf32> to vector<2xf32>
    %253 = vector.shape_cast %252 : vector<2xf32> to vector<2x1xf32>
    %254 = vector.broadcast %253 : vector<2x1xf32> to vector<2x32xf32>
    %255 = arith.cmpf oeq, %251, %254 : vector<2x32xf32>
    %c32_i32_63 = arith.constant 32 : i32
    %256 = vector.broadcast %c32_i32_63 : i32 to vector<2x32xi32>
    %257 = arith.select %255, %48, %256 : vector<2x32xi1>, vector<2x32xi32>
    %cst_64 = arith.constant dense<2147483647> : vector<2xi32>
    %258 = vector.multi_reduction <minsi>, %257, %cst_64 [1] : vector<2x32xi32> to vector<2xi32>
    %259 = vector.shape_cast %258 : vector<2xi32> to vector<2x1xi32>
    %260 = vector.broadcast %259 : vector<2x1xi32> to vector<2x32xi32>
    %261 = arith.cmpi eq, %48, %260 : vector<2x32xi32>
    %262 = arith.extui %261 : vector<2x32xi1> to vector<2x32xi32>
    %263 = arith.sitofp %262 : vector<2x32xi32> to vector<2x32xf32>
    %264 = tpu.concatenate %263, %248 in 1 : vector<2x32xf32>, vector<2x64xf32> -> vector<2x96xf32>
    %cst_65 = arith.constant dense<0.000000e+00> : vector<2x256xf32>
    %265 = tpu.matmul %264, %44, %cst_65 {dimension_numbers = #tpu.dot_dimension_numbers<[1], [0], [0], [1], [0, 0, 1, 1], [], []>} : vector<2x96xf32>, vector<96x256xf32>, vector<2x256xf32> -> vector<2x256xf32>
    %266 = vector.broadcast %45 : vector<1x256xf32> to vector<2x256xf32>
    %267 = arith.addf %265, %266 : vector<2x256xf32>
    %268 = vector.extract_strided_slice %267 {offsets = [0, 0], sizes = [2, 192], strides = [1, 1]} : vector<2x256xf32> to vector<2x192xf32>
    %269 = arith.negf %268 : vector<2x192xf32>
    %270 = math.exp %269 : vector<2x192xf32>
    %cst_66 = arith.constant 1.000000e+00 : f32
    %271 = vector.broadcast %cst_66 : f32 to vector<2x192xf32>
    %272 = arith.addf %271, %270 : vector<2x192xf32>
    %273 = arith.divf %271, %272 : vector<2x192xf32>
    %274 = vector.extract_strided_slice %267 {offsets = [0, 192], sizes = [2, 64], strides = [1, 1]} : vector<2x256xf32> to vector<2x64xf32>
    %275 = math.tanh %274 : vector<2x64xf32>
    %276 = vector.extract_strided_slice %273 {offsets = [0, 0], sizes = [2, 64], strides = [1, 1]} : vector<2x192xf32> to vector<2x64xf32>
    %277 = vector.extract_strided_slice %273 {offsets = [0, 64], sizes = [2, 64], strides = [1, 1]} : vector<2x192xf32> to vector<2x64xf32>
    %278 = vector.extract_strided_slice %273 {offsets = [0, 128], sizes = [2, 64], strides = [1, 1]} : vector<2x192xf32> to vector<2x64xf32>
    %279 = arith.mulf %277, %246 : vector<2x64xf32>
    %280 = arith.mulf %276, %275 : vector<2x64xf32>
    %281 = arith.addf %279, %280 : vector<2x64xf32>
    %282 = math.tanh %281 : vector<2x64xf32>
    %283 = arith.mulf %278, %282 : vector<2x64xf32>
    %cst_67 = arith.constant dense<0.000000e+00> : vector<2x32xf32>
    %284 = tpu.matmul %283, %46, %cst_67 {dimension_numbers = #tpu.dot_dimension_numbers<[1], [0], [0], [1], [0, 0, 1, 1], [], []>} : vector<2x64xf32>, vector<64x32xf32>, vector<2x32xf32> -> vector<2x32xf32>
    %285 = vector.broadcast %47 : vector<1x32xf32> to vector<2x32xf32>
    %286 = arith.addf %284, %285 : vector<2x32xf32>
    %cst_68 = arith.constant dense<0xFF800000> : vector<2xf32>
    %287 = vector.multi_reduction <maximumf>, %286, %cst_68 [1] : vector<2x32xf32> to vector<2xf32>
    %288 = vector.shape_cast %287 : vector<2xf32> to vector<2x1xf32>
    %289 = vector.broadcast %288 : vector<2x1xf32> to vector<2x32xf32>
    %290 = arith.cmpf oeq, %286, %289 : vector<2x32xf32>
    %c32_i32_69 = arith.constant 32 : i32
    %291 = vector.broadcast %c32_i32_69 : i32 to vector<2x32xi32>
    %292 = arith.select %290, %48, %291 : vector<2x32xi1>, vector<2x32xi32>
    %cst_70 = arith.constant dense<2147483647> : vector<2xi32>
    %293 = vector.multi_reduction <minsi>, %292, %cst_70 [1] : vector<2x32xi32> to vector<2xi32>
    %294 = vector.shape_cast %293 : vector<2xi32> to vector<2x1xi32>
    %295 = vector.broadcast %294 : vector<2x1xi32> to vector<2x32xi32>
    %296 = arith.cmpi eq, %48, %295 : vector<2x32xi32>
    %297 = arith.extui %296 : vector<2x32xi1> to vector<2x32xi32>
    %298 = arith.sitofp %297 : vector<2x32xi32> to vector<2x32xf32>
    %299 = tpu.concatenate %298, %283 in 1 : vector<2x32xf32>, vector<2x64xf32> -> vector<2x96xf32>
    %cst_71 = arith.constant dense<0.000000e+00> : vector<2x256xf32>
    %300 = tpu.matmul %299, %44, %cst_71 {dimension_numbers = #tpu.dot_dimension_numbers<[1], [0], [0], [1], [0, 0, 1, 1], [], []>} : vector<2x96xf32>, vector<96x256xf32>, vector<2x256xf32> -> vector<2x256xf32>
    %301 = vector.broadcast %45 : vector<1x256xf32> to vector<2x256xf32>
    %302 = arith.addf %300, %301 : vector<2x256xf32>
    %303 = vector.extract_strided_slice %302 {offsets = [0, 0], sizes = [2, 192], strides = [1, 1]} : vector<2x256xf32> to vector<2x192xf32>
    %304 = arith.negf %303 : vector<2x192xf32>
    %305 = math.exp %304 : vector<2x192xf32>
    %cst_72 = arith.constant 1.000000e+00 : f32
    %306 = vector.broadcast %cst_72 : f32 to vector<2x192xf32>
    %307 = arith.addf %306, %305 : vector<2x192xf32>
    %308 = arith.divf %306, %307 : vector<2x192xf32>
    %309 = vector.extract_strided_slice %302 {offsets = [0, 192], sizes = [2, 64], strides = [1, 1]} : vector<2x256xf32> to vector<2x64xf32>
    %310 = math.tanh %309 : vector<2x64xf32>
    %311 = vector.extract_strided_slice %308 {offsets = [0, 0], sizes = [2, 64], strides = [1, 1]} : vector<2x192xf32> to vector<2x64xf32>
    %312 = vector.extract_strided_slice %308 {offsets = [0, 64], sizes = [2, 64], strides = [1, 1]} : vector<2x192xf32> to vector<2x64xf32>
    %313 = vector.extract_strided_slice %308 {offsets = [0, 128], sizes = [2, 64], strides = [1, 1]} : vector<2x192xf32> to vector<2x64xf32>
    %314 = arith.mulf %312, %281 : vector<2x64xf32>
    %315 = arith.mulf %311, %310 : vector<2x64xf32>
    %316 = arith.addf %314, %315 : vector<2x64xf32>
    %317 = math.tanh %316 : vector<2x64xf32>
    %318 = arith.mulf %313, %317 : vector<2x64xf32>
    %cst_73 = arith.constant dense<0.000000e+00> : vector<2x32xf32>
    %319 = tpu.matmul %318, %46, %cst_73 {dimension_numbers = #tpu.dot_dimension_numbers<[1], [0], [0], [1], [0, 0, 1, 1], [], []>} : vector<2x64xf32>, vector<64x32xf32>, vector<2x32xf32> -> vector<2x32xf32>
    %320 = vector.broadcast %47 : vector<1x32xf32> to vector<2x32xf32>
    %321 = arith.addf %319, %320 : vector<2x32xf32>
    %322 = tpu.concatenate %76, %111, %146, %181, %216, %251, %286, %321 in 1 : vector<2x32xf32>, vector<2x32xf32>, vector<2x32xf32>, vector<2x32xf32>, vector<2x32xf32>, vector<2x32xf32>, vector<2x32xf32>, vector<2x32xf32> -> vector<2x256xf32>
    %c0_74 = arith.constant 0 : index
    %c0_75 = arith.constant 0 : index
    %323 = vector.load %arg3[%c0_74, %c0_75] : memref<2x256xf32, #tpu.memory_space<vmem>>, vector<2x256xf32>
    tpu.vector_store %arg3[%c0_74, %c0_75], %322 {strides = array<i32>} : memref<2x256xf32, #tpu.memory_space<vmem>>, vector<2x256xf32>,
    return
  }
}

</mosaic_0001>

<bundles_post_ra>
// kernel: iq_forward.1
= control target key start
LH: loop header
LB: loop body
LE: loop exit
PB: predicated region body
PF: predicated region fallthrough
CT: control target
= control target key end

     0   :  { %vm25_vm0 = vcmask 1043456   ;;  %vm21_vm1 = vcmask 31744   ;;  %v3037_v0 = vmov 0.0   ;;  %vm3038_vm2 = vmmov 0   ;;  %s3039_s18 = smov 108   ;;  %s3041_s13 = smov 4   ;;  %s3701_s1 = inlined_call_operand.vmem [shape: f32[272,64], index: 1, kind: input, shape index: {}]   ;;  %s3702_s0 = inlined_call_operand.vmem [shape: f32[2,24], index: 0, kind: input, shape index: {}]   ;;  %s3703_s2 = inlined_call_operand.vmem [shape: f32[97,256], index: 2, kind: input, shape index: {}]   ;;  %s3704_s3 = inlined_call_operand.vmem [shape: f32[2,256], index: 3, kind: output, shape index: {}]  }
   0x1   :  { %2399 = vmatprep.subr.mxu1 %v3037_v0  ;;  %v15_v1 = vld [vmem:[%s3701_s1] sm:$0xf]  ;;  %2401 = vmatprep.mubr.msk.f32.mxu1 %vm3038_vm2, %v3037_v0  ;;  %v107_v3 = vld [vmem:[%s3701_s1 + $0x50] sm:$0xf]  ;;  %v3040_v4 = vmov 0.0|0.0   ;;  %v100_v6 = vld [vmem:[%s3701_s1 + $0x18] sm:$0xff] }
   0x2   :  { %v3076_v2 = vld [vmem:[%s3702_s0] sm:$0x3]  ;;  %2400 = vmatpush3.msk.msra.mxu1 %vm25_vm0, %v15_v1  ;;  %2428 = vmatprep.subr.mxu0 %v3037_v0  ;;  %v99_v5 = vld [vmem:[%s3701_s1 + $0x10] sm:$0xff]  ;;  %v102_v9 = vld [vmem:[%s3701_s1 + $0x28] sm:$0xff]  ;;  %vm185_vm3 = vcmask 523264   ;;  %vm265_vm4 = vcmask 64512  }
   0x3   :  { %108 = vrot.lane.b32.xlu0 %v3076_v2, %s3039_s18  ;;  %2402 = vmatmul.mubr.msk.f32.vlgmr.msra.gmra.mrb[0].mxu1 %vm21_vm1, %v3076_v2  ;;  %v2612_v7 = vpack.c.bf16 %v100_v6, %v99_v5  ;;  %v101_v8 = vld [vmem:[%s3701_s1 + $0x20] sm:$0xff]  ;;  %v103_v12 = vld [vmem:[%s3701_s1 + $0x30] sm:$0xff]  ;;  %v104_v13 = vld [vmem:[%s3701_s1 + $0x38] sm:$0xff]  ;;  %s3042_s18 = smov 116   ;;  %s3043_s0 = smov 124   ;;  %vm366_vm5 = vcmask 130048  }
   0x4   :  { %2404 = vmatprep.subr.mxu1 %v3037_v0  ;;  %2406 = vmatprep.mubr.msk.f32.mxu1 %vm3038_vm2, %v3037_v0  ;;  %v2615_v11 = vpack.c.bf16 %v102_v9, %v101_v8  ;;  %v2618_v14 = vpack.c.bf16 %v104_v13, %v103_v12  ;;  %v105_v15 = vld [vmem:[%s3701_s1 + $0x40] sm:$0xff]  ;;  %v106_v16 = vld [vmem:[%s3701_s1 + $0x48] sm:$0xff]  ;;  %v259_v22 = vld [vmem:[%s3701_s1 + $0x58] sm:$0xff]  ;;  %s3044_s4 = smov 32   ;;  %s3045_s5 = smov 64   ;;  %vm570_vm7 = vcmask 261120  }
   0x5   :  { %2405 = vmatpush3.msk.msra.mxu1 %vm25_vm0, %v107_v3  ;;  %2430 = vmatprep.mubr.msk.f32.mxu0 %vm3038_vm2, %v3037_v0  ;;  %v2621_v17 = vpack.c.bf16 %v106_v16, %v105_v15  ;;  %v2243_v18 = vld [vmem:[%s3701_s1 + $0x8] ss:$0 sm:$0xff]  ;;  %v2249_v25 = vld [vmem:[%s3701_s1 + $0x60] ss:$0 sm:$0xff]  ;;  %v357_v34 = vld [vmem:[%s3701_s1 + $0x70] sm:$0xff]  ;;  %vm583_vm8 = vcmask 785408  }
   0x6   :  { %2611 = vmatprep.subr.bf16.mxu1 %v3040_v4  ;;  %2429 = vmatpush3.msra.mxu0 %v259_v22  ;;  %v356_v33 = vld [vmem:[%s3701_s1 + $0x68] sm:$0xff]  ;;  %v440_v41 = vld [vmem:[%s3701_s1 + $0x80] sm:$0xff]  ;;  %v442_v44 = vld [vmem:[%s3701_s1 + $0x90] sm:$0xff]  ;;  %vm768_vm9 = vcmask 254976   ;;  %s3046_s24 = smov 96  }
   0x7   :  { %2623 = vmatprep.subr.bf16.mxu0 %v3040_v4  ;;  %v2624_v35 = vpack.c.bf16 %v357_v34, %v356_v33  ;;  %v441_v42 = vld [vmem:[%s3701_s1 + $0x88] sm:$0xff]  ;;  %v443_v45 = vld [vmem:[%s3701_s1 + $0x98] sm:$0xff]  ;;  %v444_v48 = vld [vmem:[%s3701_s1 + $0xa0] sm:$0xff] }
   0x8   :  { %v2627_v43 = vpack.c.bf16 %v441_v42, %v440_v41  ;;  %v2630_v47 = vpack.c.bf16 %v443_v45, %v442_v44  ;;  %v445_v49 = vld [vmem:[%s3701_s1 + $0xa8] sm:$0xff]  ;;  %v446_v51 = vld [vmem:[%s3701_s1 + $0xb0] sm:$0xff]  ;;  %v447_v52 = vld [vmem:[%s3701_s1 + $0xb8] sm:$0xff] }
   0x9   :  { %v2633_v50 = vpack.c.bf16 %v445_v49, %v444_v48  ;;  %v2636_v53 = vpack.c.bf16 %v447_v52, %v446_v51  ;;  %v2253_v54 = vld [vmem:[%s3701_s1 + $0x78] ss:$0 sm:$0xff]  ;;  %v527_v59 = vld [vmem:[%s3703_s2 + $0x8] sm:$0xff]  ;;  %v526_v61 = vld [vmem:[%s3703_s2] sm:$0xff] }
   0xa   :  { %v529_v60 = vld [vmem:[%s3703_s2 + $0x18] sm:$0xff]  ;;  %v528_v63 = vld [vmem:[%s3703_s2 + $0x10] sm:$0xff]  ;;  %v531_v1 = vld [vmem:[%s3703_s2 + $0x28] sm:$0xff] }
   0xb   :  { %v3192_v62 = vpack.c.bf16 %v529_v60, %v527_v59  ;;  %v3203_v3 = vpack.c.bf16 %v528_v63, %v526_v61  ;;  %v530_v6 = vld [vmem:[%s3703_s2 + $0x20] sm:$0xff]  ;;  %v535_v8 = vld [vmem:[%s3703_s2 + $0x48] sm:$0xff]  ;;  %v537_v9 = vld [vmem:[%s3703_s2 + $0x58] sm:$0xff] }
   0xc   :  { %v534_v12 = vld [vmem:[%s3703_s2 + $0x40] sm:$0xff]  ;;  %v536_v13 = vld [vmem:[%s3703_s2 + $0x50] sm:$0xff]  ;;  %v541_v15 = vld [vmem:[%s3703_s2 + $0x78] sm:$0xff] }
   0xd   :  { %v3239_v16 = vpack.c.bf16 %v536_v13, %v534_v12  ;;  %v2255_v33 = vld [vmem:[%s3701_s1 + $0xc0] ss:$0 sm:$0xff]  ;;  %v552_v59 = vld [vmem:[%s3701_s1 + $0xc8] sm:$0xff]  ;;  %v553_v60 = vld [vmem:[%s3701_s1 + $0xd0] sm:$0xff] }
   0xe   :  { %v2257_v44 = vld [vmem:[%s3703_s2 + $0xc0] ss:$8 sm:$0x3]  ;;  %v554_v61 = vld [vmem:[%s3701_s1 + $0xd8] sm:$0xff]  ;;  %v3325_v63 = vpack.c.bf16 %v553_v60, %v552_v59 }
   0xf   :  { %v559_v12 = vld [vmem:[%s3701_s1 + $0x100] sm:$0xff] }
  0x75   :  { %v109_v10 = vpop.permute.xlu0 %108 }
  0x76   :  { %2407 = vmatmul.mubr.msk.f32.vlgmr.msra.gmra.mrb[2].mxu1 %vm21_vm1, %v109_v10 }
  0x77   :  { %2613 = vmatpush3.bf16.msra.mxu1 %v2612_v7  ;;  %2425 = vmatprep.mubr.msk.f32.mxu1 %vm3038_vm2, %v3037_v0  ;;  %v532_v7 = vld [vmem:[%s3703_s2 + $0x30] sm:$0xff] }
  0x78   :  { %2614 = vmatprep.subr.bf16.mxu1 %v3040_v4  ;;  %v3221_v10 = vpack.c.bf16 %v532_v7, %v530_v6  ;;  %v556_v6 = vld [vmem:[%s3701_s1 + $0xe8] sm:$0xff]  ;;  %v557_v7 = vld [vmem:[%s3701_s1 + $0xf0] sm:$0xff] }
  0x7b   :  { %2616 = vmatpush3.bf16.msra.mxu1 %v2615_v11  ;;  %v3224_v11 = vpack.c.bf16 %v537_v9, %v535_v8  ;;  %v3343_v8 = vpack.c.bf16 %v557_v7, %v556_v6  ;;  %v558_v9 = vld [vmem:[%s3701_s1 + $0xf8] sm:$0xff] }
  0x7c   :  { %2617 = vmatprep.subr.bf16.mxu1 %v3040_v4  ;;  %v3355_v13 = vpack.c.bf16 %v559_v12, %v558_v9 }
  0x7f   :  { %2619 = vmatpush3.bf16.msra.mxu1 %v2618_v14  ;;  %v539_v14 = vld [vmem:[%s3703_s2 + $0x68] sm:$0xff] }
  0x80   :  { %2620 = vmatprep.subr.bf16.mxu1 %v3040_v4 }
  0x83   :  { %2622 = vmatpush3.bf16.msra.mxu1 %v2621_v17  ;;  %v3242_v17 = vpack.c.bf16 %v541_v15, %v539_v14 }
  0x84   :  { %2639 = vmatprep.subr.bf16.mxu1 %v3192_v62 }
  0xd6   :  { %v95_v19 = vpop.f32.mrb[0].mxu1 }
  0xd7   :  { %v3124_v20 = vadd.f32 %v2243_v18, %v95_v19  ;;  %v2403_v21 = vpop.f32.mrb[1].mxu1  ;;  %v538_v18 = vld [vmem:[%s3703_s2 + $0x60] sm:$0xff]  ;;  %v540_v19 = vld [vmem:[%s3703_s2 + $0x70] sm:$0xff] }
  0xd8   :  { %v545_v21 = vld [vmem:[%s3703_s2 + $0x98] sm:$0xff]  ;;  %v3257_v22 = vpack.c.bf16 %v540_v19, %v538_v18 }
  0xd9   :  { %2426 = vmatmul.mubr.msk.f32.vlgmr.msra.gmra.mrb[2].mxu1 %vm185_vm3, %v3124_v20 }
  0xda   :  { %651 = vmatprep.mubr.f32.mxu1 %v3037_v0  ;;  %2641 = vmatpush1.bf16.msra.mxu1 %v3203_v3 }
 0x1ac   :  { %v255_v23 = vpop.f32.mrb[2].mxu1 }
 0x1ad   :  { %v2427_v24 = vpop.f32.mrb[3].mxu1  ;;  %2431 = vmatmul.mubr.msk.f32.vlgmr.msra.gmra.mrb[0].mxu0 %vm265_vm4, %v255_v23 }
 0x1ae   :  { %2437 = vmatprep.mubr.msk.f32.mxu0 %vm3038_vm2, %v3037_v0  ;;  %2625 = vmatpush3.bf16.msra.mxu0 %v2624_v35  ;;  %v542_v24 = vld [vmem:[%s3703_s2 + $0x80] sm:$0xff] }
 0x1af   :  { %2626 = vmatprep.subr.bf16.mxu0 %v3040_v4 }
 0x280   :  { %v335_v26 = vpop.f32.mrb[0].mxu0 }
 0x281   :  { %v336_v27 = vadd.f32 %v2249_v25, %v335_v26  ;;  %v2432_v28 = vpop.f32.mrb[1].mxu0  ;;  %v544_v25 = vld [vmem:[%s3703_s2 + $0x90] sm:$0xff]  ;;  %v547_v26 = vld [vmem:[%s3703_s2 + $0xa8] sm:$0xff] }
 0x282   :  { %v3275_v28 = vpack.c.bf16 %v544_v25, %v542_v24 }
 0x283   :  { %v2252_v29 = vclamps-f32 %v336_v27, 20.0  ;;  %v2251_v30 = vclamps-f32 %v336_v27, 2.0  ;;  %v549_v27 = vld [vmem:[%s3703_s2 + $0xb8] sm:$0xff] }
 0x285   :  { %v343_v31 = vmul.f32 0.5, %v2252_v29  ;;  %352 = vrot.lane.b32.xlu1 %v2251_v30, %s3041_s13  ;;  %v3278_v29 = vpack.c.bf16 %v549_v27, %v547_v26  ;;  %v546_v30 = vld [vmem:[%s3703_s2 + $0xa0] sm:$0xff] }
 0x287   :  { %v344_v32 = vmul.f32 1.442695, %v343_v31  ;;  %v548_v31 = vld [vmem:[%s3703_s2 + $0xb0] sm:$0xff] }
 0x289   :  { %2938 = vpow2.f32 %v344_v32  ;;  %v3287_v32 = vpack.c.bf16 %v548_v31, %v546_v30  ;;  %v3385_v31 = vld [vmem:[%s3701_s1 + $0x108] ss:$0 sm:$0xff] }
 0x293   :  { %v2939_v36 = vpop.eup %2938 }
 0x294   :  { %347 = vrot.lane.b32.xlu0 %v2939_v36, %s3042_s18 }
 0x2f7   :  { %v353_v39 = vpop.permute.xlu1 %352 }
 0x306   :  { %v348_v37 = vpop.permute.xlu0 %347 }
 0x307   :  { %v350_v38 = vmul.f32 %v348_v37, %v3076_v2  ;;  %v533_v2 = vld [vmem:[%s3703_s2 + $0x38] sm:$0xff]  ;;  %v561_v37 = vlaneseq }
 0x308   :  { %v3205_v5 = vpack.c.bf16 %v533_v2, %v531_v1  ;;  %v555_v1 = vld [vmem:[%s3701_s1 + $0xe0] sm:$0xff] }
 0x309   :  { %v355_v40 = vadd.f32 %v353_v39, %v350_v38  ;;  %v3297_v38 = vand.u32 127, %v561_v37  ;;  %v574_v42 = vshrl.u32 %v561_v37, 7  ;;  %v3331_v2 = vpack.c.bf16 %v555_v1, %v554_v61 }
 0x30a   :  { %2643 = vmatprep.subr.bf16.mxu1 %v3205_v5 }
 0x30b   :  { %364 = vrot.lane.b32.xlu1 %v355_v40, %s3043_s0  ;;  %2645 = vmatpush1.bf16.msra.mxu1 %v3221_v10  ;;  %vm563_vm6 = vcmp.eq.s32.totalorder %v3297_v38, 1 }
 0x30c   :  { %2647 = vmatprep.subr.bf16.mxu1 %v3224_v11  ;;  %v2258_v39 = vsel %vm563_vm6, 1.0, %v3037_v0 }
 0x30f   :  { %2649 = vmatpush1.bf16.msra.mxu1 %v3239_v16 }
 0x310   :  { %2651 = vmatprep.subr.bf16.mxu1 %v3242_v17 }
 0x313   :  { %2653 = vmatpush1.bf16.msra.mxu1 %v3257_v22 }
 0x37d   :  { %v365_v46 = vpop.permute.xlu1 %364 }
 0x37e   :  { %2438 = vmatmul.mubr.msk.f32.vlgmr.msra.gmra.mrb[2].mxu0 %vm366_vm5, %v365_v46 }
 0x37f   :  { %2628 = vmatpush3.bf16.msra.mxu0 %v2627_v43  ;;  %2456 = vmatprep.mubr.msk.f32.mxu0 %vm3038_vm2, %v3037_v0  ;;  %v579_v43 = vsub.s32 1, %v574_v42 }
 0x380   :  { %2629 = vmatprep.subr.bf16.mxu0 %v3040_v4 }
 0x381   :  { %v3308_v45 = vrot.slane %v2257_v44, %v579_v43 }
 0x383   :  { %2631 = vmatpush3.bf16.msra.mxu0 %v2630_v47 }
 0x384   :  { %2632 = vmatprep.subr.bf16.mxu0 %v3040_v4 }
 0x387   :  { %2634 = vmatpush3.bf16.msra.mxu0 %v2633_v50  ;;  %v575_v50 = vsub.s32 0, %v574_v42 }
 0x388   :  { %2635 = vmatprep.subr.bf16.mxu0 %v3040_v4 }
 0x389   :  { %v3312_v51 = vrot.slane %v2257_v44, %v575_v50 }
 0x38b   :  { %2637 = vmatpush3.bf16.msra.mxu0 %v2636_v53 }
 0x38c   :  { %2662 = vmatprep.subr.bf16.mxu0 %v3040_v4 }
 0x451   :  { %v435_v55 = vpop.f32.mrb[2].mxu0 }
 0x452   :  { %v436_v56 = vadd.f32 %v2253_v54, %v435_v55  ;;  %v2439_v57 = vpop.f32.mrb[3].mxu0 }
 0x454   :  { %v439_v58 = vadd.f32 %v436_v56, %v3124_v20  ;;  %v543_v20 = vld [vmem:[%s3703_s2 + $0x88] sm:$0xff] }
 0x455   :  { %v3260_v23 = vpack.c.bf16 %v545_v21, %v543_v20 }
 0x456   :  { %2457 = vmatmul.mubr.msk.f32.vlgmr.msra.gmra.mrb[4].mxu0 %vm185_vm3, %v439_v58 }
 0x457   :  { %2475 = vmatprep.mubr.msk.f32.mxu0 %vm3038_vm2, %v3037_v0  ;;  %2655 = vmatprep.subr.bf16.mxu1 %v3260_v23 }
 0x458   :  { %2657 = vmatpush1.bf16.msra.mxu1 %v3275_v28  ;;  %2664 = vmatpush3.bf16.msra.mxu0 %v3325_v63 }
 0x459   :  { %2659 = vmatprep.subr.bf16.mxu1 %v3278_v29  ;;  %2665 = vmatprep.subr.bf16.mxu0 %v3040_v4 }
 0x45c   :  { %2661 = vmatpush1.bf16.msra.mxu1 %v3287_v32  ;;  %2667 = vmatpush3.bf16.msra.mxu0 %v3331_v2 }
 0x45d   :  { %2698 = vmatprep.subr.bf16.mxu1 %v3040_v4  ;;  %2668 = vmatprep.subr.bf16.mxu0 %v3040_v4 }
 0x460   :  { %2670 = vmatpush3.bf16.msra.mxu0 %v3343_v8 }
 0x461   :  { %2671 = vmatprep.subr.bf16.mxu0 %v3040_v4 }
 0x464   :  { %2673 = vmatpush3.bf16.msra.mxu0 %v3355_v13 }
 0x465   :  { %2675 = vmatprep.subr.bf16.mxu0 %v3192_v62 }
 0x529   :  { %v522_v34 = vpop.f32.mrb[4].mxu0 }
 0x52a   :  { %v523_v35 = vadd.f32 %v2255_v33, %v522_v34  ;;  %v2458_v36 = vpop.f32.mrb[5].mxu0 }
 0x52c   :  { %567 = vrot.lane.b32.xlu0 %v523_v35, %s3044_s4 }
 0x530   :  { %671 = vrot.lane.b32.xlu0 %v523_v35, %s3045_s5 }
 0x59e   :  { %v568_v40 = vpop.permute.xlu0 %567 }
 0x59f   :  { %v571_v41 = vsel %vm570_vm7, %v2258_v39, %v568_v40 }
 0x5a0   :  { %2259 = vmatmul.mubr.msk.f32.vlgmr.msra.gmra.mrb[4].mxu1 %vm583_vm8, %v571_v41 }
 0x5a1   :  { %2494 = vmatprep.mubr.msk.f32.mxu1 %vm3038_vm2, %v3037_v0  ;;  %2700 = vmatpush3.bf16.msra.mxu1 %v3325_v63 }
 0x5a2   :  { %2701 = vmatprep.subr.bf16.mxu1 %v3040_v4  ;;  %v672_v14 = vpop.permute.xlu0 %671 }
 0x5a5   :  { %2703 = vmatpush3.bf16.msra.mxu1 %v3331_v2 }
 0x5a6   :  { %2704 = vmatprep.subr.bf16.mxu1 %v3040_v4 }
 0x5a9   :  { %2706 = vmatpush3.bf16.msra.mxu1 %v3343_v8 }
 0x5aa   :  { %2707 = vmatprep.subr.bf16.mxu1 %v3040_v4 }
 0x5ad   :  { %2709 = vmatpush3.bf16.msra.mxu1 %v3355_v13 }
 0x5ae   :  { %2711 = vmatprep.subr.bf16.mxu1 %v3192_v62 }
 0x673   :  { %v653_v46 = vpop.f32.mrb[4].mxu1 }
 0x674   :  { %v655_v47 = vpop.f32.mrb[5].mxu1  ;;  %v654_v52 = vadd.f32 %v653_v46, %v3312_v51 }
 0x675   :  { %v656_v48 = vadd.f32 %v655_v47, %v3308_v45 }
 0x676   :  { %v2260_v53 = vmul.f32 -1.442695, %v654_v52 }
 0x677   :  { %2940 = vtanh.f32 %v656_v48  ;;  %v2261_v21 = vmul.f32 -1.442695, %v656_v48 }
 0x678   :  { %2942 = vpow2.f32 %v2260_v53 }
 0x681   :  { %v2941_v49 = vpop.eup %2940 }
 0x682   :  { %676 = vrot.lane.b32.xlu1 %v2941_v49, %s3045_s5  ;;  %v2943_v54 = vpop.eup %2942 }
 0x683   :  { %v664_v55 = vadd.f32 1.0, %v2943_v54 }
 0x685   :  { %2944 = vrcp.f32 %v664_v55 }
 0x68f   :  { %v2945_v56 = vpop.eup %2944 }
 0x690   :  { %v674_v15 = vmul.f32 %v2945_v56, %v672_v14 }
 0x6f4   :  { %v677_v57 = vpop.permute.xlu1 %676 }
 0x6f5   :  { %v679_v58 = vmul.f32 %v2945_v56, %v677_v57 }
 0x6f7   :  { %681 = vrot.lane.b32.xlu1 %v679_v58, %s3045_s5 }
 0x769   :  { %v682_v18 = vpop.permute.xlu1 %681 }
 0x76a   :  { %v3364_v19 = vadd.f32 %v682_v18, %v674_v15 }
 0x76c   :  { %2946 = vtanh.f32 %v3364_v19 }
 0x76d   :  { %2948 = vpow2.f32 %v2261_v21 }
 0x776   :  { %v2947_v20 = vpop.eup %2946 }
 0x777   :  { %687 = vrot.lane.b32.xlu0 %v2947_v20, %s3045_s5  ;;  %v2949_v24 = vpop.eup %2948 }
 0x778   :  { %v665_v25 = vadd.f32 1.0, %v2949_v24 }
 0x77a   :  { %2950 = vrcp.f32 %v665_v25 }
 0x784   :  { %v2951_v26 = vpop.eup %2950 }
 0x7e9   :  { %v688_v27 = vpop.permute.xlu0 %687 }
 0x7ea   :  { %v690_v30 = vmul.f32 %v2951_v26, %v688_v27 }
 0x7ec   :  { %2476 = vmatmul.mubr.msk.f32.vlgmr.msra.gmra.mrb[6].mxu0 %vm185_vm3, %v690_v30 }
 0x7ed   :  { %2677 = vmatpush1.bf16.msra.mxu0 %v3203_v3  ;;  %863 = vmatprep.mubr.f32.mxu0 %v3037_v0 }
 0x7ee   :  { %2679 = vmatprep.subr.bf16.mxu0 %v3205_v5 }
 0x7f1   :  { %2681 = vmatpush1.bf16.msra.mxu0 %v3221_v10 }
 0x7f2   :  { %2683 = vmatprep.subr.bf16.mxu0 %v3224_v11 }
 0x7f5   :  { %2685 = vmatpush1.bf16.msra.mxu0 %v3239_v16 }
 0x7f6   :  { %2687 = vmatprep.subr.bf16.mxu0 %v3242_v17 }
 0x7f9   :  { %2689 = vmatpush1.bf16.msra.mxu0 %v3257_v22 }
 0x7fa   :  { %2691 = vmatprep.subr.bf16.mxu0 %v3260_v23 }
 0x7fd   :  { %2693 = vmatpush1.bf16.msra.mxu0 %v3275_v28 }
 0x7fe   :  { %2695 = vmatprep.subr.bf16.mxu0 %v3278_v29 }
 0x801   :  { %2697 = vmatpush1.bf16.msra.mxu0 %v3287_v32 }
 0x802   :  { %2734 = vmatprep.subr.bf16.mxu0 %v3040_v4 }
 0x8bf   :  { %v764_v33 = vpop.f32.mrb[6].mxu0 }
 0x8c0   :  { %v3388_v34 = vadd.f32 %v3385_v31, %v764_v33  ;;  %v2477_v35 = vpop.f32.mrb[7].mxu0 }
 0x8c2   :  { %v769_v36 = vsel %vm768_vm9, %v3388_v34, -inf }
 0x8c3   :  { %770 = vmax.xlane.f32.xlu1 %v769_v36 }
 0x8d4   :  { %792 = vrot.lane.b32.xlu1 %v690_v30, %s3044_s4 }
 0x950   :  { %v771_v37 = vpop.xlane.xlu1 %770 }
 0x951   :  { %vm772_vm10 = vcmp.eq.f32.partialorder %v3388_v34, %v771_v37 }
 0x952   :  { %v773_v39 = vsel %vm772_vm10, %v3297_v38, 32 }
 0x953   :  { %v774_v40 = vsel %vm768_vm9, %v773_v39, 2147483647 }
 0x954   :  { %v776_v41 = vshra.s32 %v774_v40, 16  ;;  %v775_v43 = vand.u32 65535, %v774_v40  ;;  %v793_v54 = vpop.permute.xlu1 %792 }
 0x956   :  { %v778_v42 = vcvt.s32.f32 %v776_v41  ;;  %v777_v46 = vcvt.s32.f32 %v775_v43 }
 0x958   :  { %779 = vmin.xlane.f32.xlu0 %v778_v42 }
 0x9e5   :  { %v780_v44 = vpop.xlane.xlu0 %779 }
 0x9e6   :  { %vm781_vm11 = vcmp.eq.f32.partialorder %v778_v42, %v780_v44  ;;  %v786_v48 = vcvt.f32.s32 %v780_v44 }
 0x9e7   :  { %v782_v47 = vsel %vm781_vm11, %v777_v46, inf }
 0x9e8   :  { %783 = vmin.xlane.f32.xlu0 %v782_v47  ;;  %v787_v50 = vshll.u32 %v786_v48, 16 }
 0xa75   :  { %v784_v49 = vpop.xlane.xlu0 %783 }
 0xa76   :  { %v785_v52 = vcvt.f32.s32 %v784_v49 }
 0xa78   :  { %v788_v53 = vadd.s32 %v787_v50, %v785_v52 }
 0xa7a   :  { %vm789_vm12 = vcmp.eq.s32.totalorder %v3297_v38, %v788_v53 }
 0xa7b   :  { %v2264_v55 = vsel %vm789_vm12, 1.0, %v3037_v0 }
 0xa7c   :  { %v795_v56 = vsel %vm570_vm7, %v2264_v55, %v793_v54 }
 0xa7d   :  { %2265 = vmatmul.mubr.msk.f32.vlgmr.msra.gmra.mrb[8].mxu0 %vm583_vm8, %v795_v56 }
 0xa7e   :  { %2736 = vmatpush3.bf16.msra.mxu0 %v3325_v63  ;;  %2513 = vmatprep.mubr.msk.f32.mxu0 %vm3038_vm2, %v3037_v0 }
 0xa7f   :  { %2737 = vmatprep.subr.bf16.mxu0 %v3040_v4 }
 0xa82   :  { %2739 = vmatpush3.bf16.msra.mxu0 %v3331_v2 }
 0xa83   :  { %2740 = vmatprep.subr.bf16.mxu0 %v3040_v4 }
 0xa86   :  { %2742 = vmatpush3.bf16.msra.mxu0 %v3343_v8 }
 0xa87   :  { %2743 = vmatprep.subr.bf16.mxu0 %v3040_v4 }
 0xa8a   :  { %2745 = vmatpush3.bf16.msra.mxu0 %v3355_v13 }
 0xa8b   :  { %2747 = vmatprep.subr.bf16.mxu0 %v3192_v62 }
 0xb50   :  { %v865_v57 = vpop.f32.mrb[8].mxu0 }
 0xb51   :  { %v867_v58 = vpop.f32.mrb[9].mxu0  ;;  %v866_v61 = vadd.f32 %v865_v57, %v3312_v51 }
 0xb52   :  { %v868_v59 = vadd.f32 %v867_v58, %v3308_v45 }
 0xb53   :  { %v2266_v1 = vmul.f32 -1.442695, %v866_v61 }
 0xb54   :  { %2952 = vtanh.f32 %v868_v59  ;;  %v2267_v24 = vmul.f32 -1.442695, %v868_v59 }
 0xb55   :  { %2954 = vpow2.f32 %v2266_v1 }
 0xb5e   :  { %v2953_v60 = vpop.eup %2952 }
 0xb5f   :  { %885 = vrot.lane.b32.xlu0 %v2953_v60, %s3045_s5  ;;  %v2955_v6 = vpop.eup %2954 }
 0xb60   :  { %v876_v7 = vadd.f32 1.0, %v2955_v6 }
 0xb62   :  { %2956 = vrcp.f32 %v876_v7 }
 0xb6c   :  { %v2957_v9 = vpop.eup %2956 }
 0xb6d   :  { %v883_v15 = vmul.f32 %v2957_v9, %v3364_v19 }
 0xbd1   :  { %v886_v12 = vpop.permute.xlu0 %885 }
 0xbd2   :  { %v888_v14 = vmul.f32 %v2957_v9, %v886_v12 }
 0xbd4   :  { %890 = vrot.lane.b32.xlu1 %v888_v14, %s3045_s5 }
 0xc46   :  { %v891_v18 = vpop.permute.xlu1 %890 }
 0xc47   :  { %v3415_v20 = vadd.f32 %v891_v18, %v883_v15 }
 0xc49   :  { %2958 = vtanh.f32 %v3415_v20 }
 0xc4a   :  { %2960 = vpow2.f32 %v2267_v24 }
 0xc53   :  { %v2959_v21 = vpop.eup %2958 }
 0xc54   :  { %896 = vrot.lane.b32.xlu1 %v2959_v21, %s3045_s5  ;;  %v2961_v25 = vpop.eup %2960 }
 0xc55   :  { %v877_v26 = vadd.f32 1.0, %v2961_v25 }
 0xc57   :  { %2962 = vrcp.f32 %v877_v26 }
 0xc61   :  { %v2963_v27 = vpop.eup %2962 }
 0xcc6   :  { %v897_v30 = vpop.permute.xlu1 %896 }
 0xcc7   :  { %v899_v33 = vmul.f32 %v2963_v27, %v897_v30 }
 0xcc9   :  { %2495 = vmatmul.mubr.msk.f32.vlgmr.msra.gmra.mrb[6].mxu1 %vm185_vm3, %v899_v33 }
 0xcca   :  { %2713 = vmatpush1.bf16.msra.mxu1 %v3203_v3  ;;  %1067 = vmatprep.mubr.f32.mxu1 %v3037_v0 }
 0xccb   :  { %2715 = vmatprep.subr.bf16.mxu1 %v3205_v5 }
 0xcce   :  { %2717 = vmatpush1.bf16.msra.mxu1 %v3221_v10 }
 0xccf   :  { %2719 = vmatprep.subr.bf16.mxu1 %v3224_v11 }
 0xcd2   :  { %2721 = vmatpush1.bf16.msra.mxu1 %v3239_v16 }
 0xcd3   :  { %2723 = vmatprep.subr.bf16.mxu1 %v3242_v17 }
 0xcd6   :  { %2725 = vmatpush1.bf16.msra.mxu1 %v3257_v22 }
 0xcd7   :  { %2727 = vmatprep.subr.bf16.mxu1 %v3260_v23 }
 0xcda   :  { %2729 = vmatpush1.bf16.msra.mxu1 %v3275_v28 }
 0xcdb   :  { %2731 = vmatprep.subr.bf16.mxu1 %v3278_v29 }
 0xcde   :  { %2733 = vmatpush1.bf16.msra.mxu1 %v3287_v32 }
 0xcdf   :  { %2770 = vmatprep.subr.bf16.mxu1 %v3040_v4 }
 0xd9c   :  { %v969_v19 = vpop.f32.mrb[6].mxu1 }
 0xd9d   :  { %v3434_v35 = vadd.f32 %v3385_v31, %v969_v19  ;;  %v2496_v36 = vpop.f32.mrb[7].mxu1 }
 0xd9f   :  { %v973_v37 = vsel %vm768_vm9, %v3434_v35, -inf }
 0xda0   :  { %974 = vmax.xlane.f32.xlu0 %v973_v37 }
 0xe2d   :  { %v975_v39 = vpop.xlane.xlu0 %974 }
 0xe2e   :  { %vm976_vm13 = vcmp.eq.f32.partialorder %v3434_v35, %v975_v39 }
 0xe2f   :  { %v977_v40 = vsel %vm976_vm13, %v3297_v38, 32 }
 0xe30   :  { %v978_v41 = vsel %vm768_vm9, %v977_v40, 2147483647 }
 0xe31   :  { %v980_v42 = vshra.s32 %v978_v41, 16  ;;  %v979_v44 = vand.u32 65535, %v978_v41 }
 0xe33   :  { %v982_v43 = vcvt.s32.f32 %v980_v42  ;;  %v981_v47 = vcvt.s32.f32 %v979_v44 }
 0xe35   :  { %983 = vmin.xlane.f32.xlu1 %v982_v43 }
 0xec2   :  { %v984_v46 = vpop.xlane.xlu1 %983 }
 0xec3   :  { %vm985_vm14 = vcmp.eq.f32.partialorder %v982_v43, %v984_v46  ;;  %v990_v49 = vcvt.f32.s32 %v984_v46 }
 0xec4   :  { %v986_v48 = vsel %vm985_vm14, %v981_v47, inf }
 0xec5   :  { %987 = vmin.xlane.f32.xlu0 %v986_v48  ;;  %v991_v52 = vshll.u32 %v990_v49, 16 }
 0xedb   :  { %996 = vrot.lane.b32.xlu0 %v899_v33, %s3044_s4 }
 0xf52   :  { %v988_v50 = vpop.xlane.xlu0 %987 }
 0xf53   :  { %v989_v53 = vcvt.f32.s32 %v988_v50 }
 0xf55   :  { %v992_v54 = vadd.s32 %v991_v52, %v989_v53 }
 0xf56   :  { %v997_v56 = vpop.permute.xlu0 %996 }
 0xf57   :  { %vm993_vm15 = vcmp.eq.s32.totalorder %v3297_v38, %v992_v54 }
 0xf58   :  { %v2269_v55 = vsel %vm993_vm15, 1.0, %v3037_v0 }
 0xf59   :  { %v999_v57 = vsel %vm570_vm7, %v2269_v55, %v997_v56 }
 0xf5a   :  { %2270 = vmatmul.mubr.msk.f32.vlgmr.msra.gmra.mrb[8].mxu1 %vm583_vm8, %v999_v57 }
 0xf5b   :  { %2772 = vmatpush3.bf16.msra.mxu1 %v3325_v63  ;;  %2532 = vmatprep.mubr.msk.f32.mxu1 %vm3038_vm2, %v3037_v0 }
 0xf5c   :  { %2773 = vmatprep.subr.bf16.mxu1 %v3040_v4 }
 0xf5f   :  { %2775 = vmatpush3.bf16.msra.mxu1 %v3331_v2 }
 0xf60   :  { %2776 = vmatprep.subr.bf16.mxu1 %v3040_v4 }
 0xf63   :  { %2778 = vmatpush3.bf16.msra.mxu1 %v3343_v8 }
 0xf64   :  { %2779 = vmatprep.subr.bf16.mxu1 %v3040_v4 }
 0xf67   :  { %2781 = vmatpush3.bf16.msra.mxu1 %v3355_v13 }
 0xf68   :  { %2783 = vmatprep.subr.bf16.mxu1 %v3192_v62 }
0x102d   :  { %v1069_v58 = vpop.f32.mrb[8].mxu1 }
0x102e   :  { %v1071_v59 = vpop.f32.mrb[9].mxu1  ;;  %v1070_v1 = vadd.f32 %v1069_v58, %v3312_v51 }
0x102f   :  { %v1072_v60 = vadd.f32 %v1071_v59, %v3308_v45 }
0x1030   :  { %v2271_v6 = vmul.f32 -1.442695, %v1070_v1 }
0x1031   :  { %2964 = vtanh.f32 %v1072_v60  ;;  %v2272_v26 = vmul.f32 -1.442695, %v1072_v60 }
0x1032   :  { %2966 = vpow2.f32 %v2271_v6 }
0x103b   :  { %v2965_v61 = vpop.eup %2964 }
0x103c   :  { %1089 = vrot.lane.b32.xlu1 %v2965_v61, %s3045_s5  ;;  %v2967_v7 = vpop.eup %2966 }
0x103d   :  { %v1080_v9 = vadd.f32 1.0, %v2967_v7 }
0x103f   :  { %2968 = vrcp.f32 %v1080_v9 }
0x1049   :  { %v2969_v12 = vpop.eup %2968 }
0x104a   :  { %v1087_v18 = vmul.f32 %v2969_v12, %v3415_v20 }
0x10ae   :  { %v1090_v14 = vpop.permute.xlu1 %1089 }
0x10af   :  { %v1092_v15 = vmul.f32 %v2969_v12, %v1090_v14 }
0x10b1   :  { %1094 = vrot.lane.b32.xlu1 %v1092_v15, %s3045_s5 }
0x1123   :  { %v1095_v21 = vpop.permute.xlu1 %1094 }
0x1124   :  { %v3461_v24 = vadd.f32 %v1095_v21, %v1087_v18 }
0x1126   :  { %2970 = vtanh.f32 %v3461_v24 }
0x1127   :  { %2972 = vpow2.f32 %v2272_v26 }
0x1130   :  { %v2971_v25 = vpop.eup %2970 }
0x1131   :  { %1100 = vrot.lane.b32.xlu0 %v2971_v25, %s3045_s5  ;;  %v2973_v27 = vpop.eup %2972 }
0x1132   :  { %v1081_v30 = vadd.f32 1.0, %v2973_v27 }
0x1134   :  { %2974 = vrcp.f32 %v1081_v30 }
0x113e   :  { %v2975_v33 = vpop.eup %2974 }
0x11a3   :  { %v1101_v19 = vpop.permute.xlu0 %1100 }
0x11a4   :  { %v1103_v36 = vmul.f32 %v2975_v33, %v1101_v19 }
0x11a6   :  { %2514 = vmatmul.mubr.msk.f32.vlgmr.msra.gmra.mrb[10].mxu0 %vm185_vm3, %v1103_v36 }
0x11a7   :  { %2749 = vmatpush1.bf16.msra.mxu0 %v3203_v3  ;;  %1271 = vmatprep.mubr.f32.mxu0 %v3037_v0 }
0x11a8   :  { %2751 = vmatprep.subr.bf16.mxu0 %v3205_v5 }
0x11ab   :  { %2753 = vmatpush1.bf16.msra.mxu0 %v3221_v10 }
0x11ac   :  { %2755 = vmatprep.subr.bf16.mxu0 %v3224_v11 }
0x11af   :  { %2757 = vmatpush1.bf16.msra.mxu0 %v3239_v16 }
0x11b0   :  { %2759 = vmatprep.subr.bf16.mxu0 %v3242_v17 }
0x11b3   :  { %2761 = vmatpush1.bf16.msra.mxu0 %v3257_v22 }
0x11b4   :  { %2763 = vmatprep.subr.bf16.mxu0 %v3260_v23 }
0x11b7   :  { %2765 = vmatpush1.bf16.msra.mxu0 %v3275_v28 }
0x11b8   :  { %2767 = vmatprep.subr.bf16.mxu0 %v3278_v29 }
0x11bb   :  { %2769 = vmatpush1.bf16.msra.mxu0 %v3287_v32 }
0x11bc   :  { %2806 = vmatprep.subr.bf16.mxu0 %v3040_v4 }
0x1279   :  { %v1173_v20 = vpop.f32.mrb[10].mxu0 }
0x127a   :  { %v3480_v37 = vadd.f32 %v3385_v31, %v1173_v20  ;;  %v2515_v39 = vpop.f32.mrb[11].mxu0 }
0x127c   :  { %v1177_v40 = vsel %vm768_vm9, %v3480_v37, -inf }
0x127d   :  { %1178 = vmax.xlane.f32.xlu1 %v1177_v40 }
0x128e   :  { %1200 = vrot.lane.b32.xlu1 %v1103_v36, %s3044_s4 }
0x130a   :  { %v1179_v41 = vpop.xlane.xlu1 %1178 }
0x130b   :  { %vm1180_vm0 = vcmp.eq.f32.partialorder %v3480_v37, %v1179_v41 }
0x130c   :  { %v1181_v42 = vsel %vm1180_vm0, %v3297_v38, 32 }
0x130d   :  { %v1182_v43 = vsel %vm768_vm9, %v1181_v42, 2147483647 }
0x130e   :  { %v1184_v44 = vshra.s32 %v1182_v43, 16  ;;  %v1183_v47 = vand.u32 65535, %v1182_v43  ;;  %v1201_v57 = vpop.permute.xlu1 %1200 }
0x1310   :  { %v1186_v46 = vcvt.s32.f32 %v1184_v44  ;;  %v1185_v49 = vcvt.s32.f32 %v1183_v47 }
0x1312   :  { %1187 = vmin.xlane.f32.xlu0 %v1186_v46 }
0x139f   :  { %v1188_v48 = vpop.xlane.xlu0 %1187 }
0x13a0   :  { %vm1189_vm1 = vcmp.eq.f32.partialorder %v1186_v46, %v1188_v48  ;;  %v1194_v52 = vcvt.f32.s32 %v1188_v48 }
0x13a1   :  { %v1190_v50 = vsel %vm1189_vm1, %v1185_v49, inf }
0x13a2   :  { %1191 = vmin.xlane.f32.xlu0 %v1190_v50  ;;  %v1195_v54 = vshll.u32 %v1194_v52, 16 }
0x142f   :  { %v1192_v53 = vpop.xlane.xlu0 %1191 }
0x1430   :  { %v1193_v55 = vcvt.f32.s32 %v1192_v53 }
0x1432   :  { %v1196_v56 = vadd.s32 %v1195_v54, %v1193_v55 }
0x1434   :  { %vm1197_vm4 = vcmp.eq.s32.totalorder %v3297_v38, %v1196_v56 }
0x1435   :  { %v2274_v58 = vsel %vm1197_vm4, 1.0, %v3037_v0 }
0x1436   :  { %v1203_v59 = vsel %vm570_vm7, %v2274_v58, %v1201_v57 }
0x1437   :  { %2275 = vmatmul.mubr.msk.f32.vlgmr.msra.gmra.mrb[12].mxu0 %vm583_vm8, %v1203_v59 }
0x1438   :  { %2808 = vmatpush3.bf16.msra.mxu0 %v3325_v63  ;;  %2551 = vmatprep.mubr.msk.f32.mxu0 %vm3038_vm2, %v3037_v0 }
0x1439   :  { %2809 = vmatprep.subr.bf16.mxu0 %v3040_v4 }
0x143c   :  { %2811 = vmatpush3.bf16.msra.mxu0 %v3331_v2 }
0x143d   :  { %2812 = vmatprep.subr.bf16.mxu0 %v3040_v4 }
0x1440   :  { %2814 = vmatpush3.bf16.msra.mxu0 %v3343_v8 }
0x1441   :  { %2815 = vmatprep.subr.bf16.mxu0 %v3040_v4 }
0x1444   :  { %2817 = vmatpush3.bf16.msra.mxu0 %v3355_v13 }
0x1445   :  { %2819 = vmatprep.subr.bf16.mxu0 %v3192_v62 }
0x150a   :  { %v1273_v60 = vpop.f32.mrb[12].mxu0 }
0x150b   :  { %v1275_v61 = vpop.f32.mrb[13].mxu0  ;;  %v1274_v7 = vadd.f32 %v1273_v60, %v3312_v51 }
0x150c   :  { %v1276_v1 = vadd.f32 %v1275_v61, %v3308_v45 }
0x150d   :  { %v2276_v9 = vmul.f32 -1.442695, %v1274_v7 }
0x150e   :  { %2976 = vtanh.f32 %v1276_v1  ;;  %v2277_v33 = vmul.f32 -1.442695, %v1276_v1 }
0x150f   :  { %2978 = vpow2.f32 %v2276_v9 }
0x1518   :  { %v2977_v6 = vpop.eup %2976 }
0x1519   :  { %1293 = vrot.lane.b32.xlu0 %v2977_v6, %s3045_s5  ;;  %v2979_v12 = vpop.eup %2978 }
0x151a   :  { %v1284_v14 = vadd.f32 1.0, %v2979_v12 }
0x151c   :  { %2980 = vrcp.f32 %v1284_v14 }
0x1526   :  { %v2981_v15 = vpop.eup %2980 }
0x1527   :  { %v1291_v25 = vmul.f32 %v2981_v15, %v3461_v24 }
0x158b   :  { %v1294_v18 = vpop.permute.xlu0 %1293 }
0x158c   :  { %v1296_v21 = vmul.f32 %v2981_v15, %v1294_v18 }
0x158e   :  { %1298 = vrot.lane.b32.xlu1 %v1296_v21, %s3045_s5 }
0x1600   :  { %v1299_v26 = vpop.permute.xlu1 %1298 }
0x1601   :  { %v3507_v27 = vadd.f32 %v1299_v26, %v1291_v25 }
0x1603   :  { %2982 = vtanh.f32 %v3507_v27 }
0x1604   :  { %2984 = vpow2.f32 %v2277_v33 }
0x160d   :  { %v2983_v30 = vpop.eup %2982 }
0x160e   :  { %1304 = vrot.lane.b32.xlu1 %v2983_v30, %s3045_s5  ;;  %v2985_v19 = vpop.eup %2984 }
0x160f   :  { %v1285_v36 = vadd.f32 1.0, %v2985_v19 }
0x1611   :  { %2986 = vrcp.f32 %v1285_v36 }
0x161b   :  { %v2987_v20 = vpop.eup %2986 }
0x1680   :  { %v1305_v39 = vpop.permute.xlu1 %1304 }
0x1681   :  { %v1307_v40 = vmul.f32 %v2987_v20, %v1305_v39 }
0x1683   :  { %2533 = vmatmul.mubr.msk.f32.vlgmr.msra.gmra.mrb[10].mxu1 %vm185_vm3, %v1307_v40 }
0x1684   :  { %2785 = vmatpush1.bf16.msra.mxu1 %v3203_v3  ;;  %1475 = vmatprep.mubr.f32.mxu1 %v3037_v0 }
0x1685   :  { %2787 = vmatprep.subr.bf16.mxu1 %v3205_v5 }
0x1688   :  { %2789 = vmatpush1.bf16.msra.mxu1 %v3221_v10 }
0x1689   :  { %2791 = vmatprep.subr.bf16.mxu1 %v3224_v11 }
0x168c   :  { %2793 = vmatpush1.bf16.msra.mxu1 %v3239_v16 }
0x168d   :  { %2795 = vmatprep.subr.bf16.mxu1 %v3242_v17 }
0x1690   :  { %2797 = vmatpush1.bf16.msra.mxu1 %v3257_v22 }
0x1691   :  { %2799 = vmatprep.subr.bf16.mxu1 %v3260_v23 }
0x1694   :  { %2801 = vmatpush1.bf16.msra.mxu1 %v3275_v28 }
0x1695   :  { %2803 = vmatprep.subr.bf16.mxu1 %v3278_v29 }
0x1698   :  { %2805 = vmatpush1.bf16.msra.mxu1 %v3287_v32 }
0x1699   :  { %2842 = vmatprep.subr.bf16.mxu1 %v3040_v4 }
0x1756   :  { %v1377_v24 = vpop.f32.mrb[10].mxu1 }
0x1757   :  { %v3526_v41 = vadd.f32 %v3385_v31, %v1377_v24  ;;  %v2534_v42 = vpop.f32.mrb[11].mxu1 }
0x1759   :  { %v1381_v43 = vsel %vm768_vm9, %v3526_v41, -inf }
0x175a   :  { %1382 = vmax.xlane.f32.xlu0 %v1381_v43 }
0x17e7   :  { %v1383_v44 = vpop.xlane.xlu0 %1382 }
0x17e8   :  { %vm1384_vm5 = vcmp.eq.f32.partialorder %v3526_v41, %v1383_v44 }
0x17e9   :  { %v1385_v46 = vsel %vm1384_vm5, %v3297_v38, 32 }
0x17ea   :  { %v1386_v47 = vsel %vm768_vm9, %v1385_v46, 2147483647 }
0x17eb   :  { %v1388_v48 = vshra.s32 %v1386_v47, 16  ;;  %v1387_v50 = vand.u32 65535, %v1386_v47 }
0x17ed   :  { %v1390_v49 = vcvt.s32.f32 %v1388_v48  ;;  %v1389_v53 = vcvt.s32.f32 %v1387_v50 }
0x17ef   :  { %1391 = vmin.xlane.f32.xlu1 %v1390_v49 }
0x187c   :  { %v1392_v52 = vpop.xlane.xlu1 %1391 }
0x187d   :  { %vm1393_vm6 = vcmp.eq.f32.partialorder %v1390_v49, %v1392_v52  ;;  %v1398_v55 = vcvt.f32.s32 %v1392_v52 }
0x187e   :  { %v1394_v54 = vsel %vm1393_vm6, %v1389_v53, inf }
0x187f   :  { %1395 = vmin.xlane.f32.xlu0 %v1394_v54  ;;  %v1399_v57 = vshll.u32 %v1398_v55, 16 }
0x1895   :  { %1404 = vrot.lane.b32.xlu0 %v1307_v40, %s3044_s4 }
0x190c   :  { %v1396_v56 = vpop.xlane.xlu0 %1395 }
0x190d   :  { %v1397_v58 = vcvt.f32.s32 %v1396_v56 }
0x190f   :  { %v1400_v59 = vadd.s32 %v1399_v57, %v1397_v58 }
0x1910   :  { %v1405_v61 = vpop.permute.xlu0 %1404 }
0x1911   :  { %vm1401_vm10 = vcmp.eq.s32.totalorder %v3297_v38, %v1400_v59 }
0x1912   :  { %v2279_v60 = vsel %vm1401_vm10, 1.0, %v3037_v0 }
0x1913   :  { %v1407_v1 = vsel %vm570_vm7, %v2279_v60, %v1405_v61 }
0x1914   :  { %2280 = vmatmul.mubr.msk.f32.vlgmr.msra.gmra.mrb[12].mxu1 %vm583_vm8, %v1407_v1 }
0x1915   :  { %2844 = vmatpush3.bf16.msra.mxu1 %v3325_v63  ;;  %2570 = vmatprep.mubr.msk.f32.mxu1 %vm3038_vm2, %v3037_v0 }
0x1916   :  { %2845 = vmatprep.subr.bf16.mxu1 %v3040_v4 }
0x1919   :  { %2847 = vmatpush3.bf16.msra.mxu1 %v3331_v2 }
0x191a   :  { %2848 = vmatprep.subr.bf16.mxu1 %v3040_v4 }
0x191d   :  { %2850 = vmatpush3.bf16.msra.mxu1 %v3343_v8 }
0x191e   :  { %2851 = vmatprep.subr.bf16.mxu1 %v3040_v4 }
0x1921   :  { %2853 = vmatpush3.bf16.msra.mxu1 %v3355_v13 }
0x1922   :  { %2855 = vmatprep.subr.bf16.mxu1 %v3192_v62 }
0x19e7   :  { %v1477_v6 = vpop.f32.mrb[12].mxu1 }
0x19e8   :  { %v1479_v7 = vpop.f32.mrb[13].mxu1  ;;  %v1478_v14 = vadd.f32 %v1477_v6, %v3312_v51 }
0x19e9   :  { %v1480_v9 = vadd.f32 %v1479_v7, %v3308_v45 }
0x19ea   :  { %v2281_v15 = vmul.f32 -1.442695, %v1478_v14 }
0x19eb   :  { %2988 = vtanh.f32 %v1480_v9  ;;  %v2282_v39 = vmul.f32 -1.442695, %v1480_v9 }
0x19ec   :  { %2990 = vpow2.f32 %v2281_v15 }
0x19f5   :  { %v2989_v12 = vpop.eup %2988 }
0x19f6   :  { %1497 = vrot.lane.b32.xlu1 %v2989_v12, %s3045_s5  ;;  %v2991_v18 = vpop.eup %2990 }
0x19f7   :  { %v1488_v21 = vadd.f32 1.0, %v2991_v18 }
0x19f9   :  { %2992 = vrcp.f32 %v1488_v21 }
0x1a03   :  { %v2993_v25 = vpop.eup %2992 }
0x1a04   :  { %v1495_v33 = vmul.f32 %v2993_v25, %v3507_v27 }
0x1a68   :  { %v1498_v26 = vpop.permute.xlu1 %1497 }
0x1a69   :  { %v1500_v30 = vmul.f32 %v2993_v25, %v1498_v26 }
0x1a6b   :  { %1502 = vrot.lane.b32.xlu1 %v1500_v30, %s3045_s5 }
0x1add   :  { %v1503_v19 = vpop.permute.xlu1 %1502 }
0x1ade   :  { %v3553_v36 = vadd.f32 %v1503_v19, %v1495_v33 }
0x1ae0   :  { %2994 = vtanh.f32 %v3553_v36 }
0x1ae1   :  { %2996 = vpow2.f32 %v2282_v39 }
0x1aea   :  { %v2995_v20 = vpop.eup %2994 }
0x1aeb   :  { %1508 = vrot.lane.b32.xlu0 %v2995_v20, %s3045_s5  ;;  %v2997_v40 = vpop.eup %2996 }
0x1aec   :  { %v1489_v24 = vadd.f32 1.0, %v2997_v40 }
0x1aee   :  { %2998 = vrcp.f32 %v1489_v24 }
0x1af8   :  { %v2999_v42 = vpop.eup %2998 }
0x1b5d   :  { %v1509_v43 = vpop.permute.xlu0 %1508 }
0x1b5e   :  { %v1511_v44 = vmul.f32 %v2999_v42, %v1509_v43 }
0x1b60   :  { %2552 = vmatmul.mubr.msk.f32.vlgmr.msra.gmra.mrb[14].mxu0 %vm185_vm3, %v1511_v44 }
0x1b61   :  { %2821 = vmatpush1.bf16.msra.mxu0 %v3203_v3  ;;  %1679 = vmatprep.mubr.f32.mxu0 %v3037_v0 }
0x1b62   :  { %2823 = vmatprep.subr.bf16.mxu0 %v3205_v5 }
0x1b65   :  { %2825 = vmatpush1.bf16.msra.mxu0 %v3221_v10 }
0x1b66   :  { %2827 = vmatprep.subr.bf16.mxu0 %v3224_v11 }
0x1b69   :  { %2829 = vmatpush1.bf16.msra.mxu0 %v3239_v16 }
0x1b6a   :  { %2831 = vmatprep.subr.bf16.mxu0 %v3242_v17 }
0x1b6d   :  { %2833 = vmatpush1.bf16.msra.mxu0 %v3257_v22 }
0x1b6e   :  { %2835 = vmatprep.subr.bf16.mxu0 %v3260_v23 }
0x1b71   :  { %2837 = vmatpush1.bf16.msra.mxu0 %v3275_v28 }
0x1b72   :  { %2839 = vmatprep.subr.bf16.mxu0 %v3278_v29 }
0x1b75   :  { %2841 = vmatpush1.bf16.msra.mxu0 %v3287_v32 }
0x1b76   :  { %2878 = vmatprep.subr.bf16.mxu0 %v3040_v4 }
0x1c33   :  { %v1581_v27 = vpop.f32.mrb[14].mxu0 }
0x1c34   :  { %v3572_v46 = vadd.f32 %v3385_v31, %v1581_v27  ;;  %v2553_v47 = vpop.f32.mrb[15].mxu0 }
0x1c36   :  { %v1585_v48 = vsel %vm768_vm9, %v3572_v46, -inf }
0x1c37   :  { %1586 = vmax.xlane.f32.xlu1 %v1585_v48 }
0x1c48   :  { %1608 = vrot.lane.b32.xlu1 %v1511_v44, %s3044_s4 }
0x1cc4   :  { %v1587_v49 = vpop.xlane.xlu1 %1586 }
0x1cc5   :  { %vm1588_vm11 = vcmp.eq.f32.partialorder %v3572_v46, %v1587_v49 }
0x1cc6   :  { %v1589_v50 = vsel %vm1588_vm11, %v3297_v38, 32 }
0x1cc7   :  { %v1590_v52 = vsel %vm768_vm9, %v1589_v50, 2147483647 }
0x1cc8   :  { %v1592_v53 = vshra.s32 %v1590_v52, 16  ;;  %v1591_v55 = vand.u32 65535, %v1590_v52  ;;  %v1609_v7 = vpop.permute.xlu1 %1608 }
0x1cca   :  { %v1594_v54 = vcvt.s32.f32 %v1592_v53  ;;  %v1593_v57 = vcvt.s32.f32 %v1591_v55 }
0x1ccc   :  { %1595 = vmin.xlane.f32.xlu0 %v1594_v54 }
0x1d59   :  { %v1596_v56 = vpop.xlane.xlu0 %1595 }
0x1d5a   :  { %vm1597_vm12 = vcmp.eq.f32.partialorder %v1594_v54, %v1596_v56  ;;  %v1602_v59 = vcvt.f32.s32 %v1596_v56 }
0x1d5b   :  { %v1598_v58 = vsel %vm1597_vm12, %v1593_v57, inf }
0x1d5c   :  { %1599 = vmin.xlane.f32.xlu0 %v1598_v58  ;;  %v1603_v61 = vshll.u32 %v1602_v59, 16 }
0x1de9   :  { %v1600_v60 = vpop.xlane.xlu0 %1599 }
0x1dea   :  { %v1601_v1 = vcvt.f32.s32 %v1600_v60 }
0x1dec   :  { %v1604_v6 = vadd.s32 %v1603_v61, %v1601_v1 }
0x1dee   :  { %vm1605_vm13 = vcmp.eq.s32.totalorder %v3297_v38, %v1604_v6 }
0x1def   :  { %v2284_v9 = vsel %vm1605_vm13, 1.0, %v3037_v0 }
0x1df0   :  { %v1611_v12 = vsel %vm570_vm7, %v2284_v9, %v1609_v7 }
0x1df1   :  { %2285 = vmatmul.mubr.msk.f32.vlgmr.msra.gmra.mrb[16].mxu0 %vm583_vm8, %v1611_v12 }
0x1df2   :  { %2880 = vmatpush3.bf16.msra.mxu0 %v3325_v63  ;;  %2589 = vmatprep.mubr.msk.f32.mxu0 %vm3038_vm2, %v3037_v0 }
0x1df3   :  { %2881 = vmatprep.subr.bf16.mxu0 %v3040_v4 }
0x1df6   :  { %2883 = vmatpush3.bf16.msra.mxu0 %v3331_v2 }
0x1df7   :  { %2884 = vmatprep.subr.bf16.mxu0 %v3040_v4 }
0x1dfa   :  { %2886 = vmatpush3.bf16.msra.mxu0 %v3343_v8 }
0x1dfb   :  { %2887 = vmatprep.subr.bf16.mxu0 %v3040_v4 }
0x1dfe   :  { %2889 = vmatpush3.bf16.msra.mxu0 %v3355_v13 }
0x1dff   :  { %2891 = vmatprep.subr.bf16.mxu0 %v3192_v62 }
0x1ec4   :  { %v1681_v14 = vpop.f32.mrb[16].mxu0 }
0x1ec5   :  { %v1683_v15 = vpop.f32.mrb[17].mxu0  ;;  %v1682_v25 = vadd.f32 %v1681_v14, %v3312_v51 }
0x1ec6   :  { %v1684_v18 = vadd.f32 %v1683_v15, %v3308_v45 }
0x1ec7   :  { %v2286_v26 = vmul.f32 -1.442695, %v1682_v25 }
0x1ec8   :  { %3000 = vtanh.f32 %v1684_v18  ;;  %v2287_v43 = vmul.f32 -1.442695, %v1684_v18 }
0x1ec9   :  { %3002 = vpow2.f32 %v2286_v26 }
0x1ed2   :  { %v3001_v21 = vpop.eup %3000 }
0x1ed3   :  { %1701 = vrot.lane.b32.xlu0 %v3001_v21, %s3045_s5  ;;  %v3003_v30 = vpop.eup %3002 }
0x1ed4   :  { %v1692_v33 = vadd.f32 1.0, %v3003_v30 }
0x1ed6   :  { %3004 = vrcp.f32 %v1692_v33 }
0x1ee0   :  { %v3005_v19 = vpop.eup %3004 }
0x1ee1   :  { %v1699_v62 = vmul.f32 %v3005_v19, %v3553_v36 }
0x1f45   :  { %v1702_v20 = vpop.permute.xlu0 %1701 }
0x1f46   :  { %v1704_v39 = vmul.f32 %v3005_v19, %v1702_v20 }
0x1f48   :  { %1706 = vrot.lane.b32.xlu1 %v1704_v39, %s3045_s5 }
0x1fba   :  { %v1707_v40 = vpop.permute.xlu1 %1706 }
0x1fbb   :  { %v3599_v24 = vadd.f32 %v1707_v40, %v1699_v62 }
0x1fbd   :  { %3006 = vtanh.f32 %v3599_v24 }
0x1fbe   :  { %3008 = vpow2.f32 %v2287_v43 }
0x1fc7   :  { %v3007_v42 = vpop.eup %3006 }
0x1fc8   :  { %1712 = vrot.lane.b32.xlu1 %v3007_v42, %s3045_s5  ;;  %v3009_v44 = vpop.eup %3008 }
0x1fc9   :  { %v1693_v27 = vadd.f32 1.0, %v3009_v44 }
0x1fcb   :  { %3010 = vrcp.f32 %v1693_v27 }
0x1fd5   :  { %v3011_v47 = vpop.eup %3010 }
0x203a   :  { %v1713_v48 = vpop.permute.xlu1 %1712 }
0x203b   :  { %v1715_v49 = vmul.f32 %v3011_v47, %v1713_v48 }
0x203d   :  { %2571 = vmatmul.mubr.msk.f32.vlgmr.msra.gmra.mrb[14].mxu1 %vm185_vm3, %v1715_v49 }
0x203e   :  { %2857 = vmatpush1.bf16.msra.mxu1 %v3203_v3  ;;  %1883 = vmatprep.mubr.f32.mxu1 %v3037_v0 }
0x203f   :  { %2859 = vmatprep.subr.bf16.mxu1 %v3205_v5 }
0x2042   :  { %2861 = vmatpush1.bf16.msra.mxu1 %v3221_v10 }
0x2043   :  { %2863 = vmatprep.subr.bf16.mxu1 %v3224_v11 }
0x2046   :  { %2865 = vmatpush1.bf16.msra.mxu1 %v3239_v16 }
0x2047   :  { %2867 = vmatprep.subr.bf16.mxu1 %v3242_v17 }
0x204a   :  { %2869 = vmatpush1.bf16.msra.mxu1 %v3257_v22 }
0x204b   :  { %2871 = vmatprep.subr.bf16.mxu1 %v3260_v23 }
0x204e   :  { %2873 = vmatpush1.bf16.msra.mxu1 %v3275_v28 }
0x204f   :  { %2875 = vmatprep.subr.bf16.mxu1 %v3278_v29 }
0x2052   :  { %2877 = vmatpush1.bf16.msra.mxu1 %v3287_v32 }
0x2053   :  { %2914 = vmatprep.subr.bf16.mxu1 %v3040_v4 }
0x2110   :  { %v1785_v36 = vpop.f32.mrb[14].mxu1 }
0x2111   :  { %v3618_v50 = vadd.f32 %v3385_v31, %v1785_v36  ;;  %v2572_v52 = vpop.f32.mrb[15].mxu1 }
0x2113   :  { %v1789_v53 = vsel %vm768_vm9, %v3618_v50, -inf }
0x2114   :  { %1790 = vmax.xlane.f32.xlu0 %v1789_v53 }
0x21a1   :  { %v1791_v54 = vpop.xlane.xlu0 %1790 }
0x21a2   :  { %vm1792_vm14 = vcmp.eq.f32.partialorder %v3618_v50, %v1791_v54 }
0x21a3   :  { %v1793_v55 = vsel %vm1792_vm14, %v3297_v38, 32 }
0x21a4   :  { %v1794_v56 = vsel %vm768_vm9, %v1793_v55, 2147483647 }
0x21a5   :  { %v1796_v57 = vshra.s32 %v1794_v56, 16  ;;  %v1795_v59 = vand.u32 65535, %v1794_v56 }
0x21a7   :  { %v1798_v58 = vcvt.s32.f32 %v1796_v57  ;;  %v1797_v61 = vcvt.s32.f32 %v1795_v59 }
0x21a9   :  { %1799 = vmin.xlane.f32.xlu1 %v1798_v58 }
0x2236   :  { %v1800_v60 = vpop.xlane.xlu1 %1799 }
0x2237   :  { %vm1801_vm15 = vcmp.eq.f32.partialorder %v1798_v58, %v1800_v60  ;;  %v1806_v6 = vcvt.f32.s32 %v1800_v60 }
0x2238   :  { %v1802_v1 = vsel %vm1801_vm15, %v1797_v61, inf }
0x2239   :  { %1803 = vmin.xlane.f32.xlu0 %v1802_v1  ;;  %v1807_v9 = vshll.u32 %v1806_v6, 16 }
0x224f   :  { %1812 = vrot.lane.b32.xlu0 %v1715_v49, %s3044_s4 }
0x22c6   :  { %v1804_v7 = vpop.xlane.xlu0 %1803 }
0x22c7   :  { %v1805_v12 = vcvt.f32.s32 %v1804_v7 }
0x22c9   :  { %v1808_v14 = vadd.s32 %v1807_v9, %v1805_v12 }
0x22ca   :  { %v1813_v18 = vpop.permute.xlu0 %1812 }
0x22cb   :  { %vm1809_vm0 = vcmp.eq.s32.totalorder %v3297_v38, %v1808_v14 }
0x22cc   :  { %v2289_v15 = vsel %vm1809_vm0, 1.0, %v3037_v0 }
0x22cd   :  { %v1815_v21 = vsel %vm570_vm7, %v2289_v15, %v1813_v18 }
0x22ce   :  { %2290 = vmatmul.mubr.msk.f32.vlgmr.msra.gmra.mrb[16].mxu1 %vm583_vm8, %v1815_v21 }
0x22cf   :  { %2916 = vmatpush3.bf16.msra.mxu1 %v3325_v63  ;;  %2608 = vmatprep.mubr.msk.f32.mxu1 %vm3038_vm2, %v3037_v0 }
0x22d0   :  { %2917 = vmatprep.subr.bf16.mxu1 %v3040_v4 }
0x22d3   :  { %2919 = vmatpush3.bf16.msra.mxu1 %v3331_v2 }
0x22d4   :  { %2920 = vmatprep.subr.bf16.mxu1 %v3040_v4 }
0x22d7   :  { %2922 = vmatpush3.bf16.msra.mxu1 %v3343_v8 }
0x22d8   :  { %2923 = vmatprep.subr.bf16.mxu1 %v3040_v4 }
0x22db   :  { %2925 = vmatpush3.bf16.msra.mxu1 %v3355_v13 }
0x23a1   :  { %v1885_v25 = vpop.f32.mrb[16].mxu1 }
0x23a2   :  { %v1887_v26 = vpop.f32.mrb[17].mxu1  ;;  %v1886_v33 = vadd.f32 %v1885_v25, %v3312_v51 }
0x23a3   :  { %v1888_v30 = vadd.f32 %v1887_v26, %v3308_v45 }
0x23a4   :  { %v2291_v19 = vmul.f32 -1.442695, %v1886_v33 }
0x23a5   :  { %3012 = vtanh.f32 %v1888_v30  ;;  %v2292_v43 = vmul.f32 -1.442695, %v1888_v30 }
0x23a6   :  { %3014 = vpow2.f32 %v2291_v19 }
0x23af   :  { %v3013_v63 = vpop.eup %3012 }
0x23b0   :  { %1905 = vrot.lane.b32.xlu1 %v3013_v63, %s3045_s5  ;;  %v3015_v2 = vpop.eup %3014  ;;  %v3036_v63 = vld [vmem:[%s3701_s1 + $0x108] ss:$0 sm:$0xff] }
0x23b1   :  { %v1896_v20 = vadd.f32 1.0, %v3015_v2 }
0x23b3   :  { %3016 = vrcp.f32 %v1896_v20 }
0x23bd   :  { %v3017_v8 = vpop.eup %3016 }
0x23be   :  { %v1903_v13 = vmul.f32 %v3017_v8, %v3599_v24 }
0x2422   :  { %v1906_v39 = vpop.permute.xlu1 %1905 }
0x2423   :  { %v1908_v4 = vmul.f32 %v3017_v8, %v1906_v39 }
0x2425   :  { %1910 = vrot.lane.b32.xlu1 %v1908_v4, %s3045_s5 }
0x2497   :  { %v1911_v62 = vpop.permute.xlu1 %1910 }
0x2498   :  { %v3644_v40 = vadd.f32 %v1911_v62, %v1903_v13 }
0x249a   :  { %3018 = vtanh.f32 %v3644_v40 }
0x249b   :  { %3020 = vpow2.f32 %v2292_v43 }
0x24a4   :  { %v3019_v42 = vpop.eup %3018 }
0x24a5   :  { %1916 = vrot.lane.b32.xlu0 %v3019_v42, %s3045_s5  ;;  %v3021_v44 = vpop.eup %3020 }
0x24a6   :  { %v1897_v27 = vadd.f32 1.0, %v3021_v44 }
0x24a8   :  { %3022 = vrcp.f32 %v1897_v27 }
0x24b2   :  { %v3023_v47 = vpop.eup %3022 }
0x2517   :  { %v1917_v48 = vpop.permute.xlu0 %1916 }
0x2518   :  { %v1919_v49 = vmul.f32 %v3023_v47, %v1917_v48 }
0x251a   :  { %2590 = vmatmul.mubr.msk.f32.vlgmr.msra.gmra.mrb[18].mxu0 %vm185_vm3, %v1919_v49 }
0x251b   :  { %2893 = vmatpush1.bf16.msra.mxu0 %v3203_v3  ;;  %2087 = vmatprep.mubr.f32.mxu0 %v3037_v0 }
0x251c   :  { %2895 = vmatprep.subr.bf16.mxu0 %v3205_v5 }
0x251f   :  { %2897 = vmatpush1.bf16.msra.mxu0 %v3221_v10 }
0x2520   :  { %2899 = vmatprep.subr.bf16.mxu0 %v3224_v11 }
0x2523   :  { %2901 = vmatpush1.bf16.msra.mxu0 %v3239_v16 }
0x2524   :  { %2903 = vmatprep.subr.bf16.mxu0 %v3242_v17 }
0x2527   :  { %2905 = vmatpush1.bf16.msra.mxu0 %v3257_v22 }
0x2528   :  { %2907 = vmatprep.subr.bf16.mxu0 %v3260_v23 }
0x252b   :  { %2909 = vmatpush1.bf16.msra.mxu0 %v3275_v28 }
0x252c   :  { %2911 = vmatprep.subr.bf16.mxu0 %v3278_v29 }
0x252f   :  { %2913 = vmatpush1.bf16.msra.mxu0 %v3287_v32 }
0x25ed   :  { %v1989_v3 = vpop.f32.mrb[18].mxu0 }
0x25ee   :  { %v1990_v5 = vadd.f32 %v3385_v31, %v1989_v3  ;;  %v2591_v10 = vpop.f32.mrb[19].mxu0 }
0x25f0   :  { %v1993_v11 = vsel %vm768_vm9, %v1990_v5, -inf }
0x25f1   :  { %1994 = vmax.xlane.f32.xlu1 %v1993_v11 }
0x2602   :  { %2016 = vrot.lane.b32.xlu1 %v1919_v49, %s3044_s4 }
0x267e   :  { %v1995_v16 = vpop.xlane.xlu1 %1994 }
0x267f   :  { %vm1996_vm2 = vcmp.eq.f32.partialorder %v1990_v5, %v1995_v16 }
0x2680   :  { %v1997_v17 = vsel %vm1996_vm2, %v3297_v38, 32 }
0x2681   :  { %v1998_v22 = vsel %vm768_vm9, %v1997_v17, 2147483647 }
0x2682   :  { %v2000_v23 = vshra.s32 %v1998_v22, 16  ;;  %v1999_v29 = vand.u32 65535, %v1998_v22  ;;  %v2017_v56 = vpop.permute.xlu1 %2016 }
0x2684   :  { %v2002_v28 = vcvt.s32.f32 %v2000_v23  ;;  %v2001_v24 = vcvt.s32.f32 %v1999_v29 }
0x2686   :  { %2003 = vmin.xlane.f32.xlu0 %v2002_v28 }
0x2713   :  { %v2004_v32 = vpop.xlane.xlu0 %2003 }
0x2714   :  { %vm2005_vm1 = vcmp.eq.f32.partialorder %v2002_v28, %v2004_v32  ;;  %v2010_v36 = vcvt.f32.s32 %v2004_v32 }
0x2715   :  { %v2006_v31 = vsel %vm2005_vm1, %v2001_v24, inf }
0x2716   :  { %2007 = vmin.xlane.f32.xlu0 %v2006_v31  ;;  %v2011_v53 = vshll.u32 %v2010_v36, 16 }
0x27a3   :  { %v2008_v52 = vpop.xlane.xlu0 %2007 }
0x27a4   :  { %v2009_v54 = vcvt.f32.s32 %v2008_v52 }
0x27a6   :  { %v2012_v55 = vadd.s32 %v2011_v53, %v2009_v54 }
0x27a8   :  { %vm2013_vm4 = vcmp.eq.s32.totalorder %v3297_v38, %v2012_v55 }
0x27a9   :  { %v2294_v57 = vsel %vm2013_vm4, 1.0, %v3037_v0 }
0x27aa   :  { %v2019_v58 = vsel %vm570_vm7, %v2294_v57, %v2017_v56 }
0x27ab   :  { %2295 = vmatmul.mubr.msk.f32.vlgmr.msra.gmra.mrb[20].mxu0 %vm583_vm8, %v2019_v58 }
0x287e   :  { %v2089_v59 = vpop.f32.mrb[20].mxu0 }
0x287f   :  { %v2091_v60 = vpop.f32.mrb[21].mxu0  ;;  %v2090_v0 = vadd.f32 %v2089_v59, %v3312_v51 }
0x2880   :  { %v2092_v61 = vadd.f32 %v2091_v60, %v3308_v45 }
0x2881   :  { %v2296_v38 = vmul.f32 -1.442695, %v2090_v0 }
0x2882   :  { %3024 = vtanh.f32 %v2092_v61  ;;  %v2297_v51 = vmul.f32 -1.442695, %v2092_v61 }
0x2883   :  { %3026 = vpow2.f32 %v2296_v38 }
0x288c   :  { %v3025_v1 = vpop.eup %3024 }
0x288d   :  { %2109 = vrot.lane.b32.xlu0 %v3025_v1, %s3045_s5  ;;  %v3027_v6 = vpop.eup %3026 }
0x288e   :  { %v2100_v45 = vadd.f32 1.0, %v3027_v6 }
0x2890   :  { %3028 = vrcp.f32 %v2100_v45 }
0x2891   :  { %2198 = vrot.lane.b32.xlu0 %v3434_v35, %s3044_s4 }
0x2895   :  { %2202 = vrot.lane.b32.xlu0 %v3480_v37, %s3045_s5 }
0x2899   :  { %2206 = vrot.lane.b32.xlu0 %v3526_v41, %s3046_s24 }
0x289a   :  { %v3029_v7 = vpop.eup %3028 }
0x289b   :  { %v2107_v35 = vmul.f32 %v3029_v7, %v3644_v40 }
0x28ff   :  { %v2110_v9 = vpop.permute.xlu0 %2109 }
0x2900   :  { %v2112_v12 = vmul.f32 %v3029_v7, %v2110_v9 }
0x2902   :  { %2114 = vrot.lane.b32.xlu1 %v2112_v12, %s3045_s5 }
0x2974   :  { %v2115_v14 = vpop.permute.xlu1 %2114 }
0x2975   :  { %v2117_v37 = vadd.f32 %v2115_v14, %v2107_v35 }
0x2977   :  { %3030 = vtanh.f32 %v2117_v37 }
0x2978   :  { %3032 = vpow2.f32 %v2297_v51 }
0x2981   :  { %v3031_v15 = vpop.eup %3030 }
0x2982   :  { %2120 = vrot.lane.b32.xlu1 %v3031_v15, %s3045_s5  ;;  %v3033_v41 = vpop.eup %3032 }
0x2983   :  { %v2101_v18 = vadd.f32 1.0, %v3033_v41 }
0x2985   :  { %3034 = vrcp.f32 %v2101_v18 }
0x2986   :  { %2210 = vrot.lane.b32.xlu1 %v3618_v50, %s3044_s4  ;;  %v2199_v50 = vpop.permute.xlu0 %2198 }
0x2987   :  { %v2221_v4 = vsel %vm570_vm7, %v3388_v34, %v2199_v50 }
0x298a   :  { %2214 = vrot.lane.b32.xlu1 %v1990_v5, %s3045_s5  ;;  %v2203_v20 = vpop.permute.xlu0 %2202 }
0x298b   :  { %v2222_v62 = vsel %vm185_vm3, %v2221_v4, %v2203_v20 }
0x298e   :  { %v2207_v39 = vpop.permute.xlu0 %2206 }
0x298f   :  { %v3035_v21 = vpop.eup %3034  ;;  %v2223_v43 = vsel %vm583_vm8, %v2222_v62, %v2207_v39 }
0x29f4   :  { %v2121_v25 = vpop.permute.xlu1 %2120 }
0x29f5   :  { %v2123_v26 = vmul.f32 %v3035_v21, %v2121_v25 }
0x29f7   :  { %2609 = vmatmul.mubr.msk.f32.vlgmr.msra.gmra.mrb[18].mxu1 %vm185_vm3, %v2123_v26 }
0x29f8   :  { %v2211_v2 = vpop.permute.xlu1 %2210 }
0x29f9   :  { %v2224_v13 = vsel %vm570_vm7, %v3572_v46, %v2211_v2 }
0x29fc   :  { %v2215_v8 = vpop.permute.xlu1 %2214 }
0x29fd   :  { %v2225_v40 = vsel %vm185_vm3, %v2224_v13, %v2215_v8 }
0x2aca   :  { %v2193_v30 = vpop.f32.mrb[18].mxu1 }
0x2acb   :  { %v2194_v33 = vadd.f32 %v3036_v63, %v2193_v30  ;;  %v2610_v19 = vpop.f32.mrb[19].mxu1 }
0x2acd   :  { %2218 = vrot.lane.b32.xlu1 %v2194_v33, %s3046_s24 }
0x2b3f   :  { %v2219_v42 = vpop.permute.xlu1 %2218 }
0x2b40   :  { %v2226_v44 = vsel %vm583_vm8, %v2225_v40, %v2219_v42 }
0x2b41   :  { %v2229_v27 = vcombine.low %v2223_v43, %v2226_v44 }
0x2b43   :  { %2299 = vst.sshfl [vmem:[%s3704_s3] sm:$0x33 pattern:$0x76325410] %v2229_v27 }

</bundles_post_ra>
